<compile_context>
chip_gen: v7x
topology: tpu7x:2x2x1
jax: 0.10.0
libtpu: 0.0.40
codegen_flags: <defaults>
</compile_context>

<pallas_src>
import numpy as np
import jax
import jax.numpy as jnp
from jax.experimental import pallas as pl
from jax.experimental.pallas import tpu as pltpu

# ----------------------------- model config ---------------------------------
D_MODEL = 32
N_HEADS = 4
D_KV = 8            # per-head dim
INNER = N_HEADS * D_KV
D_FF = 64
N_LAYERS = 2
VOCAB = 128
NUM_BUCKETS = 32
MAX_DIST = 128
LN_EPS = 1e-6
NEG_INF = -1e9


# ------------------------------ Pallas kernel --------------------------------
def t5_encoder_kernel(x_ref, bias_ref, ln_ref, wheads_ref, wi_ref, wof_ref, out_ref):
    # x_ref:      (PL, D)          embedded tokens of the passage tile, PL = P_TILE*L
    # bias_ref:   (1, H, PL, PL)   additive attention bias for this tile
    #                              (rel-pos bias on diagonal blocks + key-padding
    #                              mask + cross-passage -1e9), shared by all layers
    # ln_ref:     (2*NL+1, D)      rows [0,NL): pre-attn RMSNorm, [NL,2NL): pre-FF,
    #                              row 2NL: final RMSNorm
    # wheads_ref: (NL, 4*H, D, dk) per-head weights: [Wq_h | Wk_h | Wv_h | Wo_h^T]
    # wi_ref:     (NL, D, D_FF)
    # wof_ref:    (NL, D_FF, D)
    # out_ref:    (PL, D)
    PL, D = x_ref.shape
    H = bias_ref.shape[1]
    NL = wi_ref.shape[0]

    h = x_ref[...].astype(jnp.float32)                       # (PL, D)
    bias = bias_ref[0].astype(jnp.float32)                   # (H, PL, PL)

    def rms_norm(v, w):  # T5LayerNorm: no mean subtraction, no bias
        var = jnp.mean(v * v, axis=-1, keepdims=True)
        return v * jax.lax.rsqrt(var + LN_EPS) * w

    for l in range(NL):                  # unrolled at trace time (static layer index)
        wl = wheads_ref[l]                                    # (4H, D, dk)

        # ---------------- self-attention sub-layer ----------------
        n = rms_norm(h, ln_ref[l:l + 1, :])                   # (PL, D)
        nb = jnp.broadcast_to(n[None], (3 * H, PL, D))
        qkv = jnp.einsum('hnd,hde->hne', nb, wl[:3 * H],
                         preferred_element_type=jnp.float32)  # (3H, PL, dk)
        q, k, v = qkv[:H], qkv[H:2 * H], qkv[2 * H:3 * H]

        # T5 does NOT scale scores by 1/sqrt(dk); bias carries rel-pos + all masking
        s = jnp.einsum('hld,hmd->hlm', q, k,
                       preferred_element_type=jnp.float32) + bias       # (H, PL, PL)
        m = jnp.max(s, axis=-1, keepdims=True)
        p = jnp.exp(s - m)
        p = p * pl.reciprocal(jnp.sum(p, axis=-1, keepdims=True), approx=True)
        ctx = jnp.einsum('hlm,hmd->hld', p, v,
                         preferred_element_type=jnp.float32)            # (H, PL, dk)

        # output projection: sum_h ctx_h @ Wo_h (Wo heads stored transposed: (D, dk))
        attn = jnp.sum(
            jnp.einsum('hnd,hed->hne', ctx, wl[3 * H:],
                       preferred_element_type=jnp.float32),
            axis=0)                                                     # (PL, D)
        h = h + attn

        # ---------------- feed-forward sub-layer (ReLU, classic T5) ----------------
        n2 = rms_norm(h, ln_ref[NL + l:NL + l + 1, :])
        ff = jnp.maximum(
            jnp.dot(n2, wi_ref[l], preferred_element_type=jnp.float32), 0.0)
        h = h + jnp.dot(ff, wof_ref[l], preferred_element_type=jnp.float32)

    # ---------------- final layer norm of the stack ----------------
    h = rms_norm(h, ln_ref[2 * NL:2 * NL + 1, :])
    out_ref[...] = h.astype(out_ref.dtype)


# --------------------------- glue: relative bias ------------------------------
def _relative_position_bucket_np(rel_pos, num_buckets=NUM_BUCKETS, max_distance=MAX_DIST):
    # bidirectional (encoder) variant of HF T5's _relative_position_bucket
    rel_buckets = np.zeros_like(rel_pos)
    num_buckets //= 2
    rel_buckets += (rel_pos > 0).astype(np.int64) * num_buckets
    rel_pos = np.abs(rel_pos)
    max_exact = num_buckets // 2
    is_small = rel_pos < max_exact
    rel_if_large = max_exact + (
        np.log(np.maximum(rel_pos, 1).astype(np.float64) / max_exact)
        / np.log(max_distance / max_exact) * (num_buckets - max_exact)
    ).astype(np.int64)
    rel_if_large = np.minimum(rel_if_large, num_buckets - 1)
    rel_buckets += np.where(is_small, rel_pos, rel_if_large)
    return rel_buckets


def compute_relative_bias(rel_emb, seq_len):
    # rel_emb: (NUM_BUCKETS, N_HEADS) -> (H, L, L)
    ctx = np.arange(seq_len)[:, None]
    mem = np.arange(seq_len)[None, :]
    buckets = _relative_position_bucket_np(mem - ctx)           # (L, L)
    values = rel_emb[jnp.asarray(buckets)]                      # (L, L, H)
    return jnp.transpose(values, (2, 0, 1))                     # (H, L, L)


# ------------------------------- wrapper --------------------------------------
def fid_t5_encoder_forward(input_ids, attention_mask, params, num_passages,
                           passages_per_tile=None):
    B, total_len = input_ids.shape
    assert total_len % num_passages == 0
    L = total_len // num_passages
    BN = B * num_passages

    # Split the independent passage axis into 2 "parallel" grid steps so both
    # v7x TensorCores get work; on single-TC v5e/v6e the extra step costs ~0.35 us.
    if passages_per_tile is None:
        passages_per_tile = BN // 2 if BN % 2 == 0 else BN
    P_TILE = passages_per_tile
    assert BN % P_TILE == 0
    n_tiles = BN // P_TILE
    PL = P_TILE * L

    ids = input_ids.reshape(BN, L)
    key_mask = attention_mask.reshape(BN, L).astype(jnp.float32)

    # token embeddings (glue) -> lane-dense 2-D slab (BN*L, D) for the kernel
    x2d = params["emb"][ids].reshape(BN * L, D_MODEL)

    # ---- additive attention bias, fully precomputed per passage tile ----
    #   bias[t, h, p*L+i, q*L+j] = rel_bias[h,i,j]*(p==q)
    #                              + (1 - key_mask[t, q*L+j]) * NEG_INF
    #                              + NEG_INF * (p != q)        (cross-passage block mask)
    rel_bias = compute_relative_bias(params["rel_emb"], L)              # (H, L, L)
    eye = jnp.eye(P_TILE, dtype=jnp.float32)
    rel_full = (rel_bias[:, None, :, None, :] *
                eye[None, :, None, :, None]).reshape(N_HEADS, PL, PL)   # block-diag rel bias
    cross_bias = (1.0 - jnp.kron(eye, jnp.ones((L, L), jnp.float32))) * NEG_INF   # (PL, PL)
    key_bias = (1.0 - key_mask.reshape(n_tiles, PL)) * NEG_INF          # (n_tiles, PL)
    bias = (rel_full[None] + cross_bias[None, None]
            + key_bias[:, None, None, :])                               # (n_tiles, H, PL, PL)

    # ---- one-time weight layout prep (per-head slabs, packed layer norms) ----
    wq_h = params["wq"].reshape(N_LAYERS, D_MODEL, N_HEADS, D_KV).transpose(0, 2, 1, 3)
    wk_h = params["wk"].reshape(N_LAYERS, D_MODEL, N_HEADS, D_KV).transpose(0, 2, 1, 3)
    wv_h = params["wv"].reshape(N_LAYERS, D_MODEL, N_HEADS, D_KV).transpose(0, 2, 1, 3)
    woT_h = params["wo"].reshape(N_LAYERS, N_HEADS, D_KV, D_MODEL).transpose(0, 1, 3, 2)
    w_heads = jnp.concatenate([wq_h, wk_h, wv_h, woT_h], axis=1)        # (NL, 4H, D, dk)
    ln_all = jnp.concatenate([params["ln1"], params["ln2"], params["lnf"]], axis=0)

    def _full(a):
        nd = a.ndim
        return pl.BlockSpec(a.shape, lambda i, _nd=nd: (0,) * _nd)

    out2d = pl.pallas_call(
        t5_encoder_kernel,
        out_shape=jax.ShapeDtypeStruct((BN * L, D_MODEL), jnp.float32),
        grid=(n_tiles,),
        in_specs=[
            pl.BlockSpec((PL, D_MODEL), lambda i: (i, 0)),               # x2d tile
            pl.BlockSpec((1, N_HEADS, PL, PL), lambda i: (i, 0, 0, 0)),  # bias tile
            _full(ln_all),
            _full(w_heads),
            _full(params["wi"]),
            _full(params["wof"]),
        ],
        out_specs=pl.BlockSpec((PL, D_MODEL), lambda i: (i, 0)),
        compiler_params=pltpu.CompilerParams(
            dimension_semantics=("parallel",)),
    )(x2d, bias, ln_all, w_heads, params["wi"], params["wof"])

    # FiD reshape back to (B, N*L, d_model)
    return out2d.reshape(B, num_passages * L, D_MODEL)


# ------------------------------ param init ------------------------------------
def init_params(key):
    ks = jax.random.split(key, 10)
    s = 0.02
    params = {
        "emb": jax.random.normal(ks[0], (VOCAB, D_MODEL), jnp.float32) * s,
        "rel_emb": jax.random.normal(ks[1], (NUM_BUCKETS, N_HEADS), jnp.float32) * s,
        "wq": jax.random.normal(ks[2], (N_LAYERS, D_MODEL, INNER), jnp.float32) * s,
        "wk": jax.random.normal(ks[3], (N_LAYERS, D_MODEL, INNER), jnp.float32) * s,
        "wv": jax.random.normal(ks[4], (N_LAYERS, D_MODEL, INNER), jnp.float32) * s,
        "wo": jax.random.normal(ks[5], (N_LAYERS, INNER, D_MODEL), jnp.float32) * s,
        "wi": jax.random.normal(ks[6], (N_LAYERS, D_MODEL, D_FF), jnp.float32) * s,
        "wof": jax.random.normal(ks[7], (N_LAYERS, D_FF, D_MODEL), jnp.float32) * s,
        "ln1": jnp.ones((N_LAYERS, D_MODEL), jnp.float32),
        "ln2": jnp.ones((N_LAYERS, D_MODEL), jnp.float32),
        "lnf": jnp.ones((1, D_MODEL), jnp.float32),
    }
    return params


# --------------------------------- main ----------------------------------------
if __name__ == "__main__":
    key = jax.random.PRNGKey(0)
    pkey, ikey = jax.random.split(key)

    B = 2                 # batch
    NUM_PASSAGES = 2      # top-k passages per example
    L = 8                 # passage length
    TOTAL = NUM_PASSAGES * L

    params = init_params(pkey)

    input_ids = jax.random.randint(ikey, (B, TOTAL), 0, VOCAB, dtype=jnp.int32)
    # mask out the last 2 tokens of every passage (as FiD padding would)
    per_passage_mask = np.concatenate([np.ones(L - 2), np.zeros(2)]).astype(np.int32)
    attention_mask = jnp.asarray(
        np.tile(per_passage_mask, (B, NUM_PASSAGES)))            # (B, N*L)

    out = fid_t5_encoder_forward(input_ids, attention_mask, params, NUM_PASSAGES)
    out = jax.block_until_ready(out)

    assert out.shape == (B, NUM_PASSAGES * L, D_MODEL)
    assert bool(jnp.all(jnp.isfinite(out)))
    print("KERNEL_OK")
</pallas_src>

<mosaic_0001>
module attributes {stable_mosaic.version = 11 : i64} {
  func.func @t5_encoder_kernel(%arg0: i32, %arg1: memref<16x32xf32, #tpu.memory_space<vmem>>, %arg2: memref<1x4x16x16xf32, #tpu.memory_space<vmem>>, %arg3: memref<5x32xf32, #tpu.memory_space<vmem>>, %arg4: memref<2x16x32x8xf32, #tpu.memory_space<vmem>>, %arg5: memref<2x32x64xf32, #tpu.memory_space<vmem>>, %arg6: memref<2x64x32xf32, #tpu.memory_space<vmem>>, %arg7: memref<16x32xf32, #tpu.memory_space<vmem>>) attributes {dimension_semantics = [#tpu.dimension_semantics<parallel>], iteration_bounds = array<i64: 2>, scalar_prefetch = 0 : i64, scratch_operands = 0 : i64, tpu.core_type = #tpu.core_type<tc>, window_params = [{transform_indices = @transform_0, window_bounds = array<i64: 16, 32>}, {transform_indices = @transform_1, window_bounds = array<i64: 1, 4, 16, 16>}, {pipeline_mode = #tpu.pipeline_mode<synchronous>, transform_indices = @transform_2, window_bounds = array<i64: 5, 32>}, {pipeline_mode = #tpu.pipeline_mode<synchronous>, transform_indices = @transform_3, window_bounds = array<i64: 2, 16, 32, 8>}, {pipeline_mode = #tpu.pipeline_mode<synchronous>, transform_indices = @transform_4, window_bounds = array<i64: 2, 32, 64>}, {pipeline_mode = #tpu.pipeline_mode<synchronous>, transform_indices = @transform_5, window_bounds = array<i64: 2, 64, 32>}, {transform_indices = @transform_6, window_bounds = array<i64: 16, 32>}]} {
    %c0 = arith.constant 0 : index
    %c0_0 = arith.constant 0 : index
    %0 = vector.load %arg1[%c0, %c0_0] : memref<16x32xf32, #tpu.memory_space<vmem>>, vector<16x32xf32>
    %c0_1 = arith.constant 0 : index
    %c0_2 = arith.constant 0 : index
    %c0_3 = arith.constant 0 : index
    %c0_4 = arith.constant 0 : index
    %1 = vector.load %arg2[%c0_1, %c0_2, %c0_3, %c0_4] : memref<1x4x16x16xf32, #tpu.memory_space<vmem>>, vector<1x4x16x16xf32>
    %2 = vector.shape_cast %1 : vector<1x4x16x16xf32> to vector<4x16x16xf32>
    %c0_5 = arith.constant 0 : index
    %c0_6 = arith.constant 0 : index
    %c0_7 = arith.constant 0 : index
    %c0_8 = arith.constant 0 : index
    %3 = vector.load %arg4[%c0_5, %c0_6, %c0_7, %c0_8] : memref<2x16x32x8xf32, #tpu.memory_space<vmem>>, vector<1x16x32x8xf32>
    %4 = vector.shape_cast %3 : vector<1x16x32x8xf32> to vector<16x32x8xf32>
    %c0_9 = arith.constant 0 : index
    %c0_10 = arith.constant 0 : index
    %5 = vector.load %arg3[%c0_9, %c0_10] : memref<5x32xf32, #tpu.memory_space<vmem>>, vector<1x32xf32>
    %6 = arith.mulf %0, %0 : vector<16x32xf32>
    %cst = arith.constant dense<0.000000e+00> : vector<16xf32>
    %7 = vector.multi_reduction <add>, %6, %cst [1] : vector<16x32xf32> to vector<16xf32>
    %8 = vector.shape_cast %7 : vector<16xf32> to vector<16x1xf32>
    %cst_11 = arith.constant 3.200000e+01 : f32
    %9 = vector.broadcast %cst_11 : f32 to vector<16x1xf32>
    %10 = arith.divf %8, %9 : vector<16x1xf32>
    %cst_12 = arith.constant 9.99999997E-7 : f32
    %11 = vector.broadcast %cst_12 : f32 to vector<16x1xf32>
    %12 = arith.addf %10, %11 : vector<16x1xf32>
    %13 = math.rsqrt %12 : vector<16x1xf32>
    %14 = vector.broadcast %13 : vector<16x1xf32> to vector<16x32xf32>
    %15 = arith.mulf %0, %14 : vector<16x32xf32>
    %16 = vector.broadcast %5 : vector<1x32xf32> to vector<16x32xf32>
    %17 = arith.mulf %15, %16 : vector<16x32xf32>
    %18 = vector.shape_cast %17 : vector<16x32xf32> to vector<1x16x32xf32>
    %19 = vector.shape_cast %18 : vector<1x16x32xf32> to vector<1x16x32xf32>
    %20 = vector.broadcast %19 : vector<1x16x32xf32> to vector<12x16x32xf32>
    %21 = vector.extract_strided_slice %4 {offsets = [0, 0, 0], sizes = [12, 32, 8], strides = [1, 1, 1]} : vector<16x32x8xf32> to vector<12x32x8xf32>
    "tpu.trace_start"() <{level = 10 : i32, message = "hnd,hde->hne"}> : () -> ()
    %cst_13 = arith.constant dense<0.000000e+00> : vector<12x16x8xf32>
    %22 = tpu.matmul %20, %21, %cst_13 {dimension_numbers = #tpu.dot_dimension_numbers<[2], [1], [1], [2], [0, 0, 0, 1, 1, 2], [0], [0]>} : vector<12x16x32xf32>, vector<12x32x8xf32>, vector<12x16x8xf32> -> vector<12x16x8xf32>
    "tpu.trace_stop"() : () -> ()
    %23 = vector.extract_strided_slice %22 {offsets = [0, 0, 0], sizes = [4, 16, 8], strides = [1, 1, 1]} : vector<12x16x8xf32> to vector<4x16x8xf32>
    %24 = vector.extract_strided_slice %22 {offsets = [4, 0, 0], sizes = [4, 16, 8], strides = [1, 1, 1]} : vector<12x16x8xf32> to vector<4x16x8xf32>
    %25 = vector.extract_strided_slice %22 {offsets = [8, 0, 0], sizes = [4, 16, 8], strides = [1, 1, 1]} : vector<12x16x8xf32> to vector<4x16x8xf32>
    "tpu.trace_start"() <{level = 10 : i32, message = "hld,hmd->hlm"}> : () -> ()
    %cst_14 = arith.constant dense<0.000000e+00> : vector<4x16x16xf32>
    %26 = tpu.matmul %23, %24, %cst_14 {dimension_numbers = #tpu.dot_dimension_numbers<[2], [2], [1], [1], [0, 0, 0, 1, 1, 1], [0], [0]>} : vector<4x16x8xf32>, vector<4x16x8xf32>, vector<4x16x16xf32> -> vector<4x16x16xf32>
    "tpu.trace_stop"() : () -> ()
    %27 = arith.addf %26, %2 : vector<4x16x16xf32>
    %cst_15 = arith.constant dense<0xFF800000> : vector<4x16xf32>
    %28 = vector.multi_reduction <maximumf>, %27, %cst_15 [2] : vector<4x16x16xf32> to vector<4x16xf32>
    %29 = vector.shape_cast %28 : vector<4x16xf32> to vector<4x16x1xf32>
    %30 = vector.broadcast %29 : vector<4x16x1xf32> to vector<4x16x16xf32>
    %31 = arith.subf %27, %30 : vector<4x16x16xf32>
    %32 = math.exp %31 : vector<4x16x16xf32>
    %cst_16 = arith.constant dense<0.000000e+00> : vector<4x16xf32>
    %33 = vector.multi_reduction <add>, %32, %cst_16 [2] : vector<4x16x16xf32> to vector<4x16xf32>
    %34 = vector.shape_cast %33 : vector<4x16xf32> to vector<4x16x1xf32>
    %35 = tpu.reciprocal %34 {approx = true} : vector<4x16x1xf32> -> vector<4x16x1xf32>
    %36 = vector.broadcast %35 : vector<4x16x1xf32> to vector<4x16x16xf32>
    %37 = arith.mulf %32, %36 : vector<4x16x16xf32>
    "tpu.trace_start"() <{level = 10 : i32, message = "hlm,hmd->hld"}> : () -> ()
    %cst_17 = arith.constant dense<0.000000e+00> : vector<4x16x8xf32>
    %38 = tpu.matmul %37, %25, %cst_17 {dimension_numbers = #tpu.dot_dimension_numbers<[2], [1], [1], [2], [0, 0, 0, 1, 1, 2], [0], [0]>} : vector<4x16x16xf32>, vector<4x16x8xf32>, vector<4x16x8xf32> -> vector<4x16x8xf32>
    "tpu.trace_stop"() : () -> ()
    %39 = vector.extract_strided_slice %4 {offsets = [12, 0, 0], sizes = [4, 32, 8], strides = [1, 1, 1]} : vector<16x32x8xf32> to vector<4x32x8xf32>
    "tpu.trace_start"() <{level = 10 : i32, message = "hnd,hed->hne"}> : () -> ()
    %cst_18 = arith.constant dense<0.000000e+00> : vector<4x16x32xf32>
    %40 = tpu.matmul %38, %39, %cst_18 {dimension_numbers = #tpu.dot_dimension_numbers<[2], [2], [1], [1], [0, 0, 0, 1, 1, 1], [0], [0]>} : vector<4x16x8xf32>, vector<4x32x8xf32>, vector<4x16x32xf32> -> vector<4x16x32xf32>
    "tpu.trace_stop"() : () -> ()
    %cst_19 = arith.constant dense<0.000000e+00> : vector<16x32xf32>
    %41 = vector.multi_reduction <add>, %40, %cst_19 [0] : vector<4x16x32xf32> to vector<16x32xf32>
    %42 = arith.addf %0, %41 : vector<16x32xf32>
    %c2 = arith.constant 2 : index
    %c0_20 = arith.constant 0 : index
    %43 = vector.load %arg3[%c2, %c0_20] : memref<5x32xf32, #tpu.memory_space<vmem>>, vector<1x32xf32>
    %44 = arith.mulf %42, %42 : vector<16x32xf32>
    %cst_21 = arith.constant dense<0.000000e+00> : vector<16xf32>
    %45 = vector.multi_reduction <add>, %44, %cst_21 [1] : vector<16x32xf32> to vector<16xf32>
    %46 = vector.shape_cast %45 : vector<16xf32> to vector<16x1xf32>
    %cst_22 = arith.constant 3.200000e+01 : f32
    %47 = vector.broadcast %cst_22 : f32 to vector<16x1xf32>
    %48 = arith.divf %46, %47 : vector<16x1xf32>
    %cst_23 = arith.constant 9.99999997E-7 : f32
    %49 = vector.broadcast %cst_23 : f32 to vector<16x1xf32>
    %50 = arith.addf %48, %49 : vector<16x1xf32>
    %51 = math.rsqrt %50 : vector<16x1xf32>
    %52 = vector.broadcast %51 : vector<16x1xf32> to vector<16x32xf32>
    %53 = arith.mulf %42, %52 : vector<16x32xf32>
    %54 = vector.broadcast %43 : vector<1x32xf32> to vector<16x32xf32>
    %55 = arith.mulf %53, %54 : vector<16x32xf32>
    %c0_24 = arith.constant 0 : index
    %c0_25 = arith.constant 0 : index
    %c0_26 = arith.constant 0 : index
    %56 = vector.load %arg5[%c0_24, %c0_25, %c0_26] : memref<2x32x64xf32, #tpu.memory_space<vmem>>, vector<1x32x64xf32>
    %57 = vector.shape_cast %56 : vector<1x32x64xf32> to vector<32x64xf32>
    %cst_27 = arith.constant dense<0.000000e+00> : vector<16x64xf32>
    %58 = tpu.matmul %55, %57, %cst_27 {dimension_numbers = #tpu.dot_dimension_numbers<[1], [0], [0], [1], [0, 0, 1, 1], [], []>} : vector<16x32xf32>, vector<32x64xf32>, vector<16x64xf32> -> vector<16x64xf32>
    %cst_28 = arith.constant 0.000000e+00 : f32
    %59 = vector.broadcast %cst_28 : f32 to vector<16x64xf32>
    %60 = arith.maximumf %58, %59 : vector<16x64xf32>
    %c0_29 = arith.constant 0 : index
    %c0_30 = arith.constant 0 : index
    %c0_31 = arith.constant 0 : index
    %61 = vector.load %arg6[%c0_29, %c0_30, %c0_31] : memref<2x64x32xf32, #tpu.memory_space<vmem>>, vector<1x64x32xf32>
    %62 = vector.shape_cast %61 : vector<1x64x32xf32> to vector<64x32xf32>
    %cst_32 = arith.constant dense<0.000000e+00> : vector<16x32xf32>
    %63 = tpu.matmul %60, %62, %cst_32 {dimension_numbers = #tpu.dot_dimension_numbers<[1], [0], [0], [1], [0, 0, 1, 1], [], []>} : vector<16x64xf32>, vector<64x32xf32>, vector<16x32xf32> -> vector<16x32xf32>
    %64 = arith.addf %42, %63 : vector<16x32xf32>
    %c1 = arith.constant 1 : index
    %c0_33 = arith.constant 0 : index
    %c0_34 = arith.constant 0 : index
    %c0_35 = arith.constant 0 : index
    %65 = vector.load %arg4[%c1, %c0_33, %c0_34, %c0_35] : memref<2x16x32x8xf32, #tpu.memory_space<vmem>>, vector<1x16x32x8xf32>
    %66 = vector.shape_cast %65 : vector<1x16x32x8xf32> to vector<16x32x8xf32>
    %c1_36 = arith.constant 1 : index
    %c0_37 = arith.constant 0 : index
    %67 = vector.load %arg3[%c1_36, %c0_37] : memref<5x32xf32, #tpu.memory_space<vmem>>, vector<1x32xf32>
    %68 = arith.mulf %64, %64 : vector<16x32xf32>
    %cst_38 = arith.constant dense<0.000000e+00> : vector<16xf32>
    %69 = vector.multi_reduction <add>, %68, %cst_38 [1] : vector<16x32xf32> to vector<16xf32>
    %70 = vector.shape_cast %69 : vector<16xf32> to vector<16x1xf32>
    %cst_39 = arith.constant 3.200000e+01 : f32
    %71 = vector.broadcast %cst_39 : f32 to vector<16x1xf32>
    %72 = arith.divf %70, %71 : vector<16x1xf32>
    %cst_40 = arith.constant 9.99999997E-7 : f32
    %73 = vector.broadcast %cst_40 : f32 to vector<16x1xf32>
    %74 = arith.addf %72, %73 : vector<16x1xf32>
    %75 = math.rsqrt %74 : vector<16x1xf32>
    %76 = vector.broadcast %75 : vector<16x1xf32> to vector<16x32xf32>
    %77 = arith.mulf %64, %76 : vector<16x32xf32>
    %78 = vector.broadcast %67 : vector<1x32xf32> to vector<16x32xf32>
    %79 = arith.mulf %77, %78 : vector<16x32xf32>
    %80 = vector.shape_cast %79 : vector<16x32xf32> to vector<1x16x32xf32>
    %81 = vector.shape_cast %80 : vector<1x16x32xf32> to vector<1x16x32xf32>
    %82 = vector.broadcast %81 : vector<1x16x32xf32> to vector<12x16x32xf32>
    %83 = vector.extract_strided_slice %66 {offsets = [0, 0, 0], sizes = [12, 32, 8], strides = [1, 1, 1]} : vector<16x32x8xf32> to vector<12x32x8xf32>
    "tpu.trace_start"() <{level = 10 : i32, message = "hnd,hde->hne"}> : () -> ()
    %cst_41 = arith.constant dense<0.000000e+00> : vector<12x16x8xf32>
    %84 = tpu.matmul %82, %83, %cst_41 {dimension_numbers = #tpu.dot_dimension_numbers<[2], [1], [1], [2], [0, 0, 0, 1, 1, 2], [0], [0]>} : vector<12x16x32xf32>, vector<12x32x8xf32>, vector<12x16x8xf32> -> vector<12x16x8xf32>
    "tpu.trace_stop"() : () -> ()
    %85 = vector.extract_strided_slice %84 {offsets = [0, 0, 0], sizes = [4, 16, 8], strides = [1, 1, 1]} : vector<12x16x8xf32> to vector<4x16x8xf32>
    %86 = vector.extract_strided_slice %84 {offsets = [4, 0, 0], sizes = [4, 16, 8], strides = [1, 1, 1]} : vector<12x16x8xf32> to vector<4x16x8xf32>
    %87 = vector.extract_strided_slice %84 {offsets = [8, 0, 0], sizes = [4, 16, 8], strides = [1, 1, 1]} : vector<12x16x8xf32> to vector<4x16x8xf32>
    "tpu.trace_start"() <{level = 10 : i32, message = "hld,hmd->hlm"}> : () -> ()
    %cst_42 = arith.constant dense<0.000000e+00> : vector<4x16x16xf32>
    %88 = tpu.matmul %85, %86, %cst_42 {dimension_numbers = #tpu.dot_dimension_numbers<[2], [2], [1], [1], [0, 0, 0, 1, 1, 1], [0], [0]>} : vector<4x16x8xf32>, vector<4x16x8xf32>, vector<4x16x16xf32> -> vector<4x16x16xf32>
    "tpu.trace_stop"() : () -> ()
    %89 = arith.addf %88, %2 : vector<4x16x16xf32>
    %cst_43 = arith.constant dense<0xFF800000> : vector<4x16xf32>
    %90 = vector.multi_reduction <maximumf>, %89, %cst_43 [2] : vector<4x16x16xf32> to vector<4x16xf32>
    %91 = vector.shape_cast %90 : vector<4x16xf32> to vector<4x16x1xf32>
    %92 = vector.broadcast %91 : vector<4x16x1xf32> to vector<4x16x16xf32>
    %93 = arith.subf %89, %92 : vector<4x16x16xf32>
    %94 = math.exp %93 : vector<4x16x16xf32>
    %cst_44 = arith.constant dense<0.000000e+00> : vector<4x16xf32>
    %95 = vector.multi_reduction <add>, %94, %cst_44 [2] : vector<4x16x16xf32> to vector<4x16xf32>
    %96 = vector.shape_cast %95 : vector<4x16xf32> to vector<4x16x1xf32>
    %97 = tpu.reciprocal %96 {approx = true} : vector<4x16x1xf32> -> vector<4x16x1xf32>
    %98 = vector.broadcast %97 : vector<4x16x1xf32> to vector<4x16x16xf32>
    %99 = arith.mulf %94, %98 : vector<4x16x16xf32>
    "tpu.trace_start"() <{level = 10 : i32, message = "hlm,hmd->hld"}> : () -> ()
    %cst_45 = arith.constant dense<0.000000e+00> : vector<4x16x8xf32>
    %100 = tpu.matmul %99, %87, %cst_45 {dimension_numbers = #tpu.dot_dimension_numbers<[2], [1], [1], [2], [0, 0, 0, 1, 1, 2], [0], [0]>} : vector<4x16x16xf32>, vector<4x16x8xf32>, vector<4x16x8xf32> -> vector<4x16x8xf32>
    "tpu.trace_stop"() : () -> ()
    %101 = vector.extract_strided_slice %66 {offsets = [12, 0, 0], sizes = [4, 32, 8], strides = [1, 1, 1]} : vector<16x32x8xf32> to vector<4x32x8xf32>
    "tpu.trace_start"() <{level = 10 : i32, message = "hnd,hed->hne"}> : () -> ()
    %cst_46 = arith.constant dense<0.000000e+00> : vector<4x16x32xf32>
    %102 = tpu.matmul %100, %101, %cst_46 {dimension_numbers = #tpu.dot_dimension_numbers<[2], [2], [1], [1], [0, 0, 0, 1, 1, 1], [0], [0]>} : vector<4x16x8xf32>, vector<4x32x8xf32>, vector<4x16x32xf32> -> vector<4x16x32xf32>
    "tpu.trace_stop"() : () -> ()
    %cst_47 = arith.constant dense<0.000000e+00> : vector<16x32xf32>
    %103 = vector.multi_reduction <add>, %102, %cst_47 [0] : vector<4x16x32xf32> to vector<16x32xf32>
    %104 = arith.addf %64, %103 : vector<16x32xf32>
    %c3 = arith.constant 3 : index
    %c0_48 = arith.constant 0 : index
    %105 = vector.load %arg3[%c3, %c0_48] : memref<5x32xf32, #tpu.memory_space<vmem>>, vector<1x32xf32>
    %106 = arith.mulf %104, %104 : vector<16x32xf32>
    %cst_49 = arith.constant dense<0.000000e+00> : vector<16xf32>
    %107 = vector.multi_reduction <add>, %106, %cst_49 [1] : vector<16x32xf32> to vector<16xf32>
    %108 = vector.shape_cast %107 : vector<16xf32> to vector<16x1xf32>
    %cst_50 = arith.constant 3.200000e+01 : f32
    %109 = vector.broadcast %cst_50 : f32 to vector<16x1xf32>
    %110 = arith.divf %108, %109 : vector<16x1xf32>
    %cst_51 = arith.constant 9.99999997E-7 : f32
    %111 = vector.broadcast %cst_51 : f32 to vector<16x1xf32>
    %112 = arith.addf %110, %111 : vector<16x1xf32>
    %113 = math.rsqrt %112 : vector<16x1xf32>
    %114 = vector.broadcast %113 : vector<16x1xf32> to vector<16x32xf32>
    %115 = arith.mulf %104, %114 : vector<16x32xf32>
    %116 = vector.broadcast %105 : vector<1x32xf32> to vector<16x32xf32>
    %117 = arith.mulf %115, %116 : vector<16x32xf32>
    %c1_52 = arith.constant 1 : index
    %c0_53 = arith.constant 0 : index
    %c0_54 = arith.constant 0 : index
    %118 = vector.load %arg5[%c1_52, %c0_53, %c0_54] : memref<2x32x64xf32, #tpu.memory_space<vmem>>, vector<1x32x64xf32>
    %119 = vector.shape_cast %118 : vector<1x32x64xf32> to vector<32x64xf32>
    %cst_55 = arith.constant dense<0.000000e+00> : vector<16x64xf32>
    %120 = tpu.matmul %117, %119, %cst_55 {dimension_numbers = #tpu.dot_dimension_numbers<[1], [0], [0], [1], [0, 0, 1, 1], [], []>} : vector<16x32xf32>, vector<32x64xf32>, vector<16x64xf32> -> vector<16x64xf32>
    %cst_56 = arith.constant 0.000000e+00 : f32
    %121 = vector.broadcast %cst_56 : f32 to vector<16x64xf32>
    %122 = arith.maximumf %120, %121 : vector<16x64xf32>
    %c1_57 = arith.constant 1 : index
    %c0_58 = arith.constant 0 : index
    %c0_59 = arith.constant 0 : index
    %123 = vector.load %arg6[%c1_57, %c0_58, %c0_59] : memref<2x64x32xf32, #tpu.memory_space<vmem>>, vector<1x64x32xf32>
    %124 = vector.shape_cast %123 : vector<1x64x32xf32> to vector<64x32xf32>
    %cst_60 = arith.constant dense<0.000000e+00> : vector<16x32xf32>
    %125 = tpu.matmul %122, %124, %cst_60 {dimension_numbers = #tpu.dot_dimension_numbers<[1], [0], [0], [1], [0, 0, 1, 1], [], []>} : vector<16x64xf32>, vector<64x32xf32>, vector<16x32xf32> -> vector<16x32xf32>
    %126 = arith.addf %104, %125 : vector<16x32xf32>
    %c4 = arith.constant 4 : index
    %c0_61 = arith.constant 0 : index
    %127 = vector.load %arg3[%c4, %c0_61] : memref<5x32xf32, #tpu.memory_space<vmem>>, vector<1x32xf32>
    %128 = arith.mulf %126, %126 : vector<16x32xf32>
    %cst_62 = arith.constant dense<0.000000e+00> : vector<16xf32>
    %129 = vector.multi_reduction <add>, %128, %cst_62 [1] : vector<16x32xf32> to vector<16xf32>
    %130 = vector.shape_cast %129 : vector<16xf32> to vector<16x1xf32>
    %cst_63 = arith.constant 3.200000e+01 : f32
    %131 = vector.broadcast %cst_63 : f32 to vector<16x1xf32>
    %132 = arith.divf %130, %131 : vector<16x1xf32>
    %cst_64 = arith.constant 9.99999997E-7 : f32
    %133 = vector.broadcast %cst_64 : f32 to vector<16x1xf32>
    %134 = arith.addf %132, %133 : vector<16x1xf32>
    %135 = math.rsqrt %134 : vector<16x1xf32>
    %136 = vector.broadcast %135 : vector<16x1xf32> to vector<16x32xf32>
    %137 = arith.mulf %126, %136 : vector<16x32xf32>
    %138 = vector.broadcast %127 : vector<1x32xf32> to vector<16x32xf32>
    %139 = arith.mulf %137, %138 : vector<16x32xf32>
    %c0_65 = arith.constant 0 : index
    %c0_66 = arith.constant 0 : index
    %140 = vector.load %arg7[%c0_65, %c0_66] : memref<16x32xf32, #tpu.memory_space<vmem>>, vector<16x32xf32>
    tpu.vector_store %arg7[%c0_65, %c0_66], %139 {strides = array<i32>} : memref<16x32xf32, #tpu.memory_space<vmem>>, vector<16x32xf32>,
    return
  }
  func.func @transform_0(%arg0: i32) -> (i32, i32) {
    %c0_i32 = arith.constant 0 : i32
    %c0_i32_0 = arith.constant 0 : i32
    return %arg0, %c0_i32 : i32, i32
  }
  func.func @transform_1(%arg0: i32) -> (i32, i32, i32, i32) {
    %c0_i32 = arith.constant 0 : i32
    %c0_i32_0 = arith.constant 0 : i32
    %c0_i32_1 = arith.constant 0 : i32
    %c0_i32_2 = arith.constant 0 : i32
    return %arg0, %c0_i32, %c0_i32_0, %c0_i32_1 : i32, i32, i32, i32
  }
  func.func @transform_2(%arg0: i32) -> (i32, i32) {
    %c0_i32 = arith.constant 0 : i32
    %c0_i32_0 = arith.constant 0 : i32
    %c0_i32_1 = arith.constant 0 : i32
    return %c0_i32, %c0_i32_0 : i32, i32
  }
  func.func @transform_3(%arg0: i32) -> (i32, i32, i32, i32) {
    %c0_i32 = arith.constant 0 : i32
    %c0_i32_0 = arith.constant 0 : i32
    %c0_i32_1 = arith.constant 0 : i32
    %c0_i32_2 = arith.constant 0 : i32
    %c0_i32_3 = arith.constant 0 : i32
    return %c0_i32, %c0_i32_0, %c0_i32_1, %c0_i32_2 : i32, i32, i32, i32
  }
  func.func @transform_4(%arg0: i32) -> (i32, i32, i32) {
    %c0_i32 = arith.constant 0 : i32
    %c0_i32_0 = arith.constant 0 : i32
    %c0_i32_1 = arith.constant 0 : i32
    %c0_i32_2 = arith.constant 0 : i32
    return %c0_i32, %c0_i32_0, %c0_i32_1 : i32, i32, i32
  }
  func.func @transform_5(%arg0: i32) -> (i32, i32, i32) {
    %c0_i32 = arith.constant 0 : i32
    %c0_i32_0 = arith.constant 0 : i32
    %c0_i32_1 = arith.constant 0 : i32
    %c0_i32_2 = arith.constant 0 : i32
    return %c0_i32, %c0_i32_0, %c0_i32_1 : i32, i32, i32
  }
  func.func @transform_6(%arg0: i32) -> (i32, i32) {
    %c0_i32 = arith.constant 0 : i32
    %c0_i32_0 = arith.constant 0 : i32
    return %arg0, %c0_i32 : i32, i32
  }
}

</mosaic_0001>

<bundles_post_ra>
// kernel: tpu_custom_call.1
= control target key start
LH: loop header
LB: loop body
LE: loop exit
PB: predicated region body
PF: predicated region fallthrough
CT: control target
= control target key end

     0   :  { %11 = vsyncpa [#allocation3], 0  ;;  %s7790_s0 = inlined_call_operand.vmem [shape: f32[32,32], index: 0, kind: input, shape index: {}]   ;;  %s7791_s1 = inlined_call_operand.vmem [shape: f32[2,4,16,16], index: 1, kind: input, shape index: {}]   ;;  %s7792_s2 = inlined_call_operand.vmem [shape: f32[5,32], index: 2, kind: input, shape index: {}]   ;;  %s7793_s3 = inlined_call_operand.vmem [shape: f32[2,16,32,8], index: 3, kind: input, shape index: {}]   ;;  %s7794_s4 = inlined_call_operand.vmem [shape: f32[2,32,64], index: 4, kind: input, shape index: {}]   ;;  %s7795_s5 = inlined_call_operand.vmem [shape: f32[2,64,32], index: 5, kind: input, shape index: {}]   ;;  %s7796_s6 = inlined_call_operand.hbm [shape: f32[32,32], index: 6, kind: output, shape index: {}]  }
   0x1   :  { %13 = vsyncpa [#allocation3 + $0x1], 0  ;;  %s6793_s21 = smov 0   ;;  %s6795_s22 = smov 0  }
   0x2   :  { %s6797_s23 = smov 0   ;;  %s6799_s24 = smov 0  }
   0x3 LB: > { %s6814_s25 = sadd.s32 4294967295, %s6753_s24   ;;  %s5088_s26 = sadd.s32 4294967294, %s6753_s24   ;;  %s6753_s24 = sphi %s6799_s24, %s7804_s24   ;;  %s6749_s23 = sphi %s6797_s23, %s7803_s23   ;;  %s6745_s22 = sphi %s6795_s22, %s7802_s22   ;;  %s6741_s21 = sphi %s6793_s21, %s7801_s21  }
   0x4   : > { %s6818_s27 = sadd.s32 1, %s6753_s24   ;;  %s162_s28 = sadd.s32 1, %s6749_s23 }
   0x5   : > { %s159_s29 = ssub.s32 %s6753_s24, %s6818_s27  ;;  %p172_p0 = scmp.ne.s32.totalorder %s6749_s23, %s6745_s22 }
   0x6   : > { %p160_p1 = scmp.eq.s32.totalorder %s159_s29, 0  ;;  %p173_p2 = scmp.eq.s32.totalorder %s6814_s25, 1 }
   0x7   : > { %p178_p3 = scmp.ne.s32.totalorder %s6745_s22, %s6741_s21  ;;  %p179_p4 = scmp.eq.s32.totalorder %s5088_s26, 1 }
   0x8   : > { %s6829_s30 = scalar_select %p160_p1, %s6749_s23, %s162_s28  }
   0x9   : > { %p6831_p5 = por %p173_p2, %p172_p0  ;;  %p6835_p6 = por %p179_p4, %p178_p3 }
   0xa   : > { %p5091_p7 = scmp.ge.s32.totalorder %s6753_s24, 1  ;;  %p226_p8 = scmp.lt.s32.totalorder %s6753_s24, 3 }
   0xc   : > { %p227_p9 = pnand %p5091_p7, %p226_p8 }
   0xd   : > { %s5093_s9 = sshll.u32 (!%p227_p9), %s6814_s25, 1  ;;  %vm350_vm0 = vcmask (!%p227_p9), 261120   ;;  %v283_v6 = vld [vmem:[%s7793_s3] sm:$0xff] (!%p227_p9)  ;;  %v284_v7 = vld [vmem:[%s7793_s3 + $0x8] sm:$0xff] (!%p227_p9)  ;;  %v285_v12 = vld [vmem:[%s7793_s3 + $0x10] sm:$0xff] (!%p227_p9)  ;;  %vm1278_vm1 = vcmask (!%p227_p9), 64512  }
   0xe   : > { %230 = sbr.rel (%p227_p9) target bundleno = 4180 (0x1054), region = 44  ;;  %p262_p10 = scmp.lt.s32.totalorder (!%p227_p9), %s5093_s9, 3  ;;  %v287_v8 = vld [vmem:[%s7793_s3 + $0x20] sm:$0xff] (!%p227_p9)  ;;  %v6149_v9 = vpack.c.bf16 (!%p227_p9), %v284_v7, %v283_v6  ;;  %v288_v10 = vld [vmem:[%s7793_s3 + $0x28] sm:$0xff] (!%p227_p9)  ;;  %v286_v13 = vld [vmem:[%s7793_s3 + $0x18] sm:$0xff] (!%p227_p9)  ;;  %vm1627_vm3 = vcmask (!%p227_p9), 130048  }
   0xf   : > { %v6157_v11 = vpack.c.bf16 (!%p227_p9), %v288_v10, %v287_v8  ;;  %v289_v14 = vld [vmem:[%s7793_s3 + $0x30] sm:$0xff] (!%p227_p9)  ;;  %v6153_v15 = vpack.c.bf16 (!%p227_p9), %v286_v13, %v285_v12  ;;  %v290_v16 = vld [vmem:[%s7793_s3 + $0x38] sm:$0xff] (!%p227_p9)  ;;  %v291_v18 = vld [vmem:[%s7793_s3 + $0x40] sm:$0xff] (!%p227_p9)  ;;  %p267_p11 = scmp.lt.s32.totalorder (!%p227_p9), %s6814_s25, 1  ;;  %vm2546_vm4 = vcmask (!%p227_p9), 523264   ;;  %s258_s12 = sand.u32 (!%p227_p9), 1, %s6745_s22  }
  0x10   : > { %6150 = vmatprep.subr.bf16.mxu0 (!%p227_p9), %v6149_v9  ;;  %v6161_v17 = vpack.c.bf16 (!%p227_p9), %v290_v16, %v289_v14  ;;  %v292_v19 = vld [vmem:[%s7793_s3 + $0x48] sm:$0xff] (!%p227_p9)  ;;  %v295_v20 = vld [vmem:[%s7793_s3 + $0x60] sm:$0xff] (!%p227_p9)  ;;  %v293_v35 = vld [vmem:[%s7793_s3 + $0x50] sm:$0xff] (!%p227_p9)  ;;  %s5336_s15 = sshll.u32 (!%p227_p9), %s6814_s25, 8 }
  0x11   : > { %6158 = vmatprep.subr.bf16.mxu1 (!%p227_p9), %v6157_v11  ;;  %6152 = vmatpush3.bf16.msra.mxu0 (!%p227_p9), %v6149_v9  ;;  %v6165_v21 = vpack.c.bf16 (!%p227_p9), %v292_v19, %v291_v18  ;;  %v296_v22 = vld [vmem:[%s7793_s3 + $0x68] sm:$0xff] (!%p227_p9)  ;;  %v5097_v31 = vld [vmem:[%s7792_s2] ss:$0 sm:$0xff] (!%p227_p9)  ;;  %v294_v37 = vld [vmem:[%s7793_s3 + $0x58] sm:$0xff] (!%p227_p9)  ;;  %s7743_s20 = scalar_lea.hbm (!%p227_p9), %s7796_s6, %s5336_s15 }
  0x12   : > { %6160 = vmatpush3.bf16.msra.mxu1 (!%p227_p9), %v6157_v11  ;;  %6154 = vmatprep.subr.bf16.mxu0 (!%p227_p9), %v6153_v15  ;;  %v6173_v23 = vpack.c.bf16 (!%p227_p9), %v296_v22, %v295_v20  ;;  %v297_v38 = vld [vmem:[%s7793_s3 + $0x70] sm:$0xff] (!%p227_p9)  ;;  %v298_v39 = vld [vmem:[%s7793_s3 + $0x78] sm:$0xff] (!%p227_p9)  ;;  %v299_v41 = vld [vmem:[%s7793_s3 + $0x80] sm:$0xff] (!%p227_p9)  ;;  %v6169_v42 = vpack.c.bf16 (!%p227_p9), %v294_v37, %v293_v35 }
  0x13   : > { %6162 = vmatprep.subr.bf16.mxu1 (!%p227_p9), %v6161_v17  ;;  %v6177_v43 = vpack.c.bf16 (!%p227_p9), %v298_v39, %v297_v38  ;;  %v300_v44 = vld [vmem:[%s7793_s3 + $0x88] sm:$0xff] (!%p227_p9)  ;;  %v303_v45 = vld [vmem:[%s7793_s3 + $0xa0] sm:$0xff] (!%p227_p9)  ;;  %v301_v49 = vld [vmem:[%s7793_s3 + $0x90] sm:$0xff] (!%p227_p9) }
  0x14   : > { %v304_v46 = vld [vmem:[%s7793_s3 + $0xa8] sm:$0xff] (!%p227_p9)  ;;  %v6181_v47 = vpack.c.bf16 (!%p227_p9), %v300_v44, %v299_v41  ;;  %v302_v50 = vld [vmem:[%s7793_s3 + $0x98] sm:$0xff] (!%p227_p9)  ;;  %v305_v51 = vld [vmem:[%s7793_s3 + $0xb0] sm:$0xff] (!%p227_p9) }
  0x15   : > { %s7806_s9 = smov (!%p262_p10, %s5093_s9), 3  ;;  %6156 = vmatpush3.bf16.msra.mxu0 %v6153_v15  ;;  %v6189_v48 = vpack.c.bf16 %v304_v46, %v303_v45  ;;  %v306_v52 = vld [vmem:[%s7793_s3 + $0xb8] sm:$0xff]  ;;  %v6185_v53 = vpack.c.bf16 %v302_v50, %v301_v49  ;;  %v307_v55 = vld [vmem:[%s7793_s3 + $0xc0] sm:$0xff]  ;;  %v308_v56 = vld [vmem:[%s7793_s3 + $0xc8] sm:$0xff] }
  0x16   : > { %s5094_s10 = sshll.u32 %s7806_s9, 3  ;;  %6164 = vmatpush3.bf16.msra.mxu1 %v6161_v17  ;;  %6166 = vmatprep.subr.bf16.mxu0 %v6165_v21  ;;  %v6193_v54 = vpack.c.bf16 %v306_v52, %v305_v51  ;;  %v311_v57 = vld [vmem:[%s7793_s3 + $0xe0] sm:$0xff]  ;;  %v312_v58 = vld [vmem:[%s7793_s3 + $0xe8] sm:$0xff]  ;;  %v6197_v59 = vpack.c.bf16 %v308_v56, %v307_v55  ;;  %v309_v61 = vld [vmem:[%s7793_s3 + $0xd0] sm:$0xff] }
  0x17   : > { %s265_s13 = scalar_lea.vmem %s7790_s0, %s5094_s10  ;;  %6174 = vmatprep.subr.bf16.mxu1 %v6173_v23  ;;  %v6205_v60 = vpack.c.bf16 %v312_v58, %v311_v57  ;;  %v310_v62 = vld [vmem:[%s7793_s3 + $0xd8] sm:$0xff]  ;;  %v313_v63 = vld [vmem:[%s7793_s3 + $0xf0] sm:$0xff]  ;;  %v319_v7 = vld [vmem:[%s7793_s3 + $0x120] sm:$0xff] }
  0x18   : > { %v6845_v0 = vld [vmem:[%s265_s13] sm:$0xff]  ;;  %v6847_v1 = vld [vmem:[%s265_s13 + $0x8] sm:$0xff]  ;;  %v317_v11 = vld [vmem:[%s7793_s3 + $0x110] sm:$0xff]  ;;  %s268_s28 = scalar_select %p267_p11, %s6814_s25, 1 }
  0x19   : > { %v348_v2 = vmul.f32 %v6845_v0, %v6845_v0  ;;  %v349_v3 = vmul.f32 %v6847_v1, %v6847_v1  ;;  %v320_v8 = vld [vmem:[%s7793_s3 + $0x128] sm:$0xff]  ;;  %v318_v12 = vld [vmem:[%s7793_s3 + $0x118] sm:$0xff]  ;;  %v321_v13 = vld [vmem:[%s7793_s3 + $0x130] sm:$0xff]  ;;  %s5092_s13 = sshll.u32 %s258_s12, 4  ;;  %s7749_s25 = scalar_lea.sflag [#allocation3], %s258_s12 }
  0x1a   : > { %v6221_v10 = vpack.c.bf16 %v320_v8, %v319_v7  ;;  %v322_v14 = vld [vmem:[%s7793_s3 + $0x138] sm:$0xff]  ;;  %v6217_v15 = vpack.c.bf16 %v318_v12, %v317_v11  ;;  %v323_v16 = vld [vmem:[%s7793_s3 + $0x140] sm:$0xff]  ;;  %v324_v17 = vld [vmem:[%s7793_s3 + $0x148] sm:$0xff]  ;;  %s5335_s29 = sshll.u32 %s268_s28, 6  ;;  %s260_s16 = scalar_lea.vmem [#allocation2], %s5092_s13 }
  0x1b   : > { %v351_v4 = vsel %vm350_vm0, %v348_v2, 0.0  ;;  %v354_v5 = vsel %vm350_vm0, %v349_v3, 0.0  ;;  %v314_v2 = vld [vmem:[%s7793_s3 + $0xf8] sm:$0xff]  ;;  %v6201_v3 = vpack.c.bf16 %v310_v62, %v309_v61  ;;  %v6225_v18 = vpack.c.bf16 %v322_v14, %v321_v13  ;;  %v327_v19 = vld [vmem:[%s7793_s3 + $0x160] sm:$0xff]  ;;  %v328_v20 = vld [vmem:[%s7793_s3 + $0x168] sm:$0xff]  ;;  %s7096_s11 = scalar_lea.vmem %s7791_s1, %s5335_s29  ;;  %s5014_s17 = sshll.u32 %s260_s16, 4  ;;  %s7745_s17 = int_to_ptr.vmem [resolvable:$true] %s5014_s17 }
  0x1c   : > { %352 = vadd.xlane.f32.xlu0 %v351_v4  ;;  %v315_v4 = vld [vmem:[%s7793_s3 + $0x100] sm:$0xff]  ;;  %v6209_v6 = vpack.c.bf16 %v314_v2, %v313_v63  ;;  %v6237_v22 = vpack.c.bf16 %v328_v20, %v327_v19  ;;  %vm7060_vm2 = vmpackc.low %vm1278_vm1, %vm1278_vm1  ;;  %v277_v2 = vld [vmem:[%s7096_s11 + $0x10] sm:$0xff]  ;;  %s6691_s26 = scalar_lea.vmem %s7745_s17, 256  ;;  %s6755_s28 = smov [#allocation2]  }
  0x1d   : > { %v7099_v62 = vld [vmem:[%s7096_s11] sm:$0xff]  ;;  %v7109_v11 = vld [vmem:[%s7096_s11 + $0x18] sm:$0xff]  ;;  %v7121_v20 = vld [vmem:[%s7096_s11 + $0x30] sm:$0xff]  ;;  %p6692_p12 = scmp.ne.s32.totalorder %s7745_s17, %s6691_s26  ;;  %s6695_s29 = sshll.u32 %s6755_s28, 4  ;;  %s6696_s29 = int_to_ptr.vmem [resolvable:$false] %s6695_s29 }
  0x1e   : > { %v7114_v14 = vld [vmem:[%s7096_s11 + $0x20] sm:$0xff]  ;;  %s6697_s9 = scalar_lea.vmem %s6696_s29, 512  ;;  %p6698_p1 = scmp.lt.s32.totalorder %s7745_s17, %s6696_s29 }
  0x1f   : > { %p6693_p13 = pnand %p6692_p12, %p6831_p5  ;;  %p6699_p2 = scmp.lt.s32.totalorder %s6697_s9, %s6691_s26 }
  0x20   : > { %355 = vadd.xlane.f32.xlu0 %v354_v5  ;;  %v316_v5 = vld [vmem:[%s7793_s3 + $0x108] sm:$0xff] }
  0x21   : > { %v6213_v9 = vpack.c.bf16 %v316_v5, %v315_v4  ;;  %p6694_p0 = pneg %p6693_p13  ;;  %p6700_p3 = por %p6699_p2, %p6698_p1 }
  0x23   : > { %p6701_p4 = pnand %p6700_p3, %p6694_p0 }
  0xa9   : > { %v353_v24 = vpop.xlane.xlu0 %352 }
  0xaa   : > { %v358_v25 = vmul.f32 0.03125, %v353_v24  ;;  %v326_v24 = vld [vmem:[%s7793_s3 + $0x158] sm:$0xff] }
  0xac   : > { %v360_v26 = vadd.f32 1e-06, %v358_v25  ;;  %v329_v25 = vld [vmem:[%s7793_s3 + $0x170] sm:$0xff] }
  0xad   : > { %v356_v27 = vpop.xlane.xlu0 %355 }
  0xae   : > { %6606 = vrsqrt.f32 %v360_v26  ;;  %v359_v28 = vmul.f32 0.03125, %v356_v27  ;;  %v330_v26 = vld [vmem:[%s7793_s3 + $0x178] sm:$0xff] }
  0xb0   : > { %v361_v29 = vadd.f32 1e-06, %v359_v28  ;;  %v6241_v28 = vpack.c.bf16 %v330_v26, %v329_v25  ;;  %v7127_v25 = vld [vmem:[%s7096_s11 + $0x38] sm:$0xff] }
  0xb2   : > { %6608 = vrsqrt.f32 %v361_v29 }
  0xb8   : > { %v6607_v30 = vpop.eup %6606 }
  0xb9   : > { %v364_v32 = vmul.f32 %v6607_v30, %v6845_v0 }
  0xbb   : > { %v6895_v33 = vmul.f32 %v5097_v31, %v364_v32 }
  0xbc   : > { %v6609_v34 = vpop.eup %6608 }
  0xbd   : > { %v365_v36 = vmul.f32 %v6609_v34, %v6847_v1  ;;  %5633 = vmatprep.mubr.msk.f32.mxu0 %vm350_vm0, %v6895_v33  ;;  %5644 = vmatprep.mubr.msk.f32.mxu1 %vm350_vm0, %v6895_v33 }
  0xbf   : > { %v6914_v40 = vmul.f32 %v5097_v31, %v365_v36 }
  0xc1   : > { %5634 = vmatmul.mubr.msk.f32.vlgmr.msra.gmra.mrb[0].mxu0 %vm350_vm0, %v6914_v40  ;;  %5645 = vmatmul.mubr.msk.f32.vlgmr.msra.gmra.mrb[0].mxu1 %vm350_vm0, %v6914_v40 }
  0xc2   : > { %6168 = vmatpush3.bf16.msra.mxu0 %v6165_v21  ;;  %6176 = vmatpush3.bf16.msra.mxu1 %v6173_v23  ;;  %v6229_v21 = vpack.c.bf16 %v324_v17, %v323_v16  ;;  %v325_v23 = vld [vmem:[%s7793_s3 + $0x150] sm:$0xff]  ;;  %v7118_v16 = vld [vmem:[%s7096_s11 + $0x28] sm:$0xff] }
  0xc3   : > { %5655 = vmatprep.mubr.msk.f32.mxu0 %vm350_vm0, %v6895_v33  ;;  %5666 = vmatprep.mubr.msk.f32.mxu1 %vm350_vm0, %v6895_v33  ;;  %v6233_v27 = vpack.c.bf16 %v326_v24, %v325_v23 }
  0xc4   : > { %6170 = vmatprep.subr.bf16.mxu0 %v6169_v42  ;;  %6178 = vmatprep.subr.bf16.mxu1 %v6177_v43 }
  0xc6   : > { %6172 = vmatpush3.bf16.msra.mxu0 %v6169_v42  ;;  %6180 = vmatpush3.bf16.msra.mxu1 %v6177_v43 }
  0xc7   : > { %6182 = vmatprep.subr.bf16.mxu0 %v6181_v47  ;;  %6190 = vmatprep.subr.bf16.mxu1 %v6189_v48 }
  0xc9   : > { %5656 = vmatmul.mubr.msk.f32.vlgmr.msra.gmra.mrb[2].mxu0 %vm350_vm0, %v6914_v40  ;;  %5667 = vmatmul.mubr.msk.f32.vlgmr.msra.gmra.mrb[2].mxu1 %vm350_vm0, %v6914_v40 }
  0xca   : > { %6184 = vmatpush3.bf16.msra.mxu0 %v6181_v47  ;;  %5677 = vmatprep.mubr.msk.f32.mxu0 %vm350_vm0, %v6895_v33 }
  0xcb   : > { %6192 = vmatpush3.bf16.msra.mxu1 %v6189_v48  ;;  %5688 = vmatprep.mubr.msk.f32.mxu1 %vm350_vm0, %v6895_v33 }
  0xcc   : > { %6186 = vmatprep.subr.bf16.mxu0 %v6185_v53  ;;  %6194 = vmatprep.subr.bf16.mxu1 %v6193_v54 }
  0xce   : > { %6188 = vmatpush3.bf16.msra.mxu0 %v6185_v53 }
  0xcf   : > { %6196 = vmatpush3.bf16.msra.mxu1 %v6193_v54  ;;  %6198 = vmatprep.subr.bf16.mxu0 %v6197_v59 }
  0xd0   : > { %6206 = vmatprep.subr.bf16.mxu1 %v6205_v60 }
  0xd1   : > { %5678 = vmatmul.mubr.msk.f32.vlgmr.msra.gmra.mrb[4].mxu0 %vm350_vm0, %v6914_v40 }
  0xd2   : > { %5689 = vmatmul.mubr.msk.f32.vlgmr.msra.gmra.mrb[4].mxu1 %vm350_vm0, %v6914_v40  ;;  %6200 = vmatpush3.bf16.msra.mxu0 %v6197_v59 }
  0xd3   : > { %5699 = vmatprep.mubr.msk.f32.mxu0 %vm350_vm0, %v6895_v33  ;;  %6208 = vmatpush3.bf16.msra.mxu1 %v6205_v60 }
  0xd4   : > { %5710 = vmatprep.mubr.msk.f32.mxu1 %vm350_vm0, %v6895_v33  ;;  %6202 = vmatprep.subr.bf16.mxu0 %v6201_v3 }
  0xd5   : > { %6210 = vmatprep.subr.bf16.mxu1 %v6209_v6 }
  0xd6   : > { %6204 = vmatpush3.bf16.msra.mxu0 %v6201_v3  ;;  %v7103_v3 = vld [vmem:[%s7096_s11 + $0x8] sm:$0xff] }
  0xd7   : > { %6212 = vmatpush3.bf16.msra.mxu1 %v6209_v6  ;;  %6214 = vmatprep.subr.bf16.mxu0 %v6213_v9 }
  0xd8   : > { %6222 = vmatprep.subr.bf16.mxu1 %v6221_v10 }
  0xd9   : > { %5700 = vmatmul.mubr.msk.f32.vlgmr.msra.gmra.mrb[6].mxu0 %vm350_vm0, %v6914_v40 }
  0xda   : > { %5711 = vmatmul.mubr.msk.f32.vlgmr.msra.gmra.mrb[6].mxu1 %vm350_vm0, %v6914_v40  ;;  %6216 = vmatpush3.bf16.msra.mxu0 %v6213_v9 }
  0xdb   : > { %5721 = vmatprep.mubr.msk.f32.mxu0 %vm350_vm0, %v6895_v33  ;;  %6224 = vmatpush3.bf16.msra.mxu1 %v6221_v10 }
  0xdc   : > { %5732 = vmatprep.mubr.msk.f32.mxu1 %vm350_vm0, %v6895_v33  ;;  %6218 = vmatprep.subr.bf16.mxu0 %v6217_v15 }
  0xdd   : > { %6226 = vmatprep.subr.bf16.mxu1 %v6225_v18 }
  0xde   : > { %6220 = vmatpush3.bf16.msra.mxu0 %v6217_v15 }
  0xdf   : > { %6228 = vmatpush3.bf16.msra.mxu1 %v6225_v18  ;;  %6230 = vmatprep.subr.bf16.mxu0 %v6229_v21 }
  0xe0   : > { %6238 = vmatprep.subr.bf16.mxu1 %v6237_v22 }
  0xe1   : > { %5722 = vmatmul.mubr.msk.f32.vlgmr.msra.gmra.mrb[8].mxu0 %vm350_vm0, %v6914_v40 }
  0xe2   : > { %5733 = vmatmul.mubr.msk.f32.vlgmr.msra.gmra.mrb[8].mxu1 %vm350_vm0, %v6914_v40  ;;  %6232 = vmatpush3.bf16.msra.mxu0 %v6229_v21 }
  0xe3   : > { %5743 = vmatprep.mubr.msk.f32.mxu0 %vm350_vm0, %v6895_v33  ;;  %6240 = vmatpush3.bf16.msra.mxu1 %v6237_v22 }
  0xe4   : > { %5754 = vmatprep.mubr.msk.f32.mxu1 %vm350_vm0, %v6895_v33  ;;  %6234 = vmatprep.subr.bf16.mxu0 %v6233_v27 }
  0xe5   : > { %6242 = vmatprep.subr.bf16.mxu1 %v6241_v28 }
  0xe6   : > { %6236 = vmatpush3.bf16.msra.mxu0 %v6233_v27 }
  0xe7   : > { %6244 = vmatpush3.bf16.msra.mxu1 %v6241_v28 }
  0xe9   : > { %5744 = vmatmul.mubr.msk.f32.vlgmr.msra.gmra.mrb[10].mxu0 %vm350_vm0, %v6914_v40 }
  0xea   : > { %5755 = vmatmul.mubr.msk.f32.vlgmr.msra.gmra.mrb[10].mxu1 %vm350_vm0, %v6914_v40 }
 0x194   : > { %v5635_v29 = vpop.f32.mrb[0].mxu0  ;;  %v5646_v30 = vpop.f32.mrb[0].mxu1 }
 0x195   : > { %v444_v31 = vpop.f32.mrb[1].mxu0  ;;  %v519_v32 = vpop.f32.mrb[1].mxu1 }
 0x196   : > { %5761 = vmatprep.mubr.msk.f32.mxu0 %vm1278_vm1, %v444_v31  ;;  %5768 = vmatprep.mubr.msk.f32.mxu1 %vm1278_vm1, %v519_v32 }
 0x19c   : > { %v5657_v33 = vpop.f32.mrb[2].mxu0  ;;  %v5668_v34 = vpop.f32.mrb[2].mxu1 }
 0x19d   : > { %v594_v35 = vpop.f32.mrb[3].mxu0  ;;  %v669_v36 = vpop.f32.mrb[3].mxu1 }
 0x1a4   : > { %v5679_v37 = vpop.f32.mrb[4].mxu0 }
 0x1a5   : > { %v5690_v38 = vpop.f32.mrb[4].mxu1  ;;  %v744_v39 = vpop.f32.mrb[5].mxu0 }
 0x1a6   : > { %v6245_v41 = vpack.c.bf16 %v5679_v37, %v744_v39  ;;  %v819_v42 = vpop.f32.mrb[5].mxu1 }
 0x1a7   : > { %v6251_v43 = vpack.c.bf16 %v5690_v38, %v819_v42 }
 0x1a8   : > { %6247 = vmatprep.subr.msk.bf16.mxu0 %vm7060_vm2, %v6245_v41 }
 0x1a9   : > { %6253 = vmatprep.subr.msk.bf16.mxu1 %vm7060_vm2, %v6251_v43  ;;  %6250 = vmatpush3.bf16.xpose.msk.msra.mxu0 %vm7060_vm2, %v6245_v41 }
 0x1aa   : > { %6256 = vmatpush3.bf16.xpose.msk.msra.mxu1 %vm7060_vm2, %v6251_v43 }
 0x1ac   : > { %v5701_v44 = vpop.f32.mrb[6].mxu0 }
 0x1ad   : > { %v5712_v45 = vpop.f32.mrb[6].mxu1  ;;  %v894_v46 = vpop.f32.mrb[7].mxu0 }
 0x1ae   : > { %v6257_v47 = vpack.c.bf16 %v5701_v44, %v894_v46  ;;  %v969_v48 = vpop.f32.mrb[7].mxu1 }
 0x1af   : > { %v6263_v49 = vpack.c.bf16 %v5712_v45, %v969_v48 }
 0x1b0   : > { %5762 = vmatmul.mubr.msk.f32.vlgmr.msra.gmra.mrb[12].mxu0 %vm1278_vm1, %v5635_v29  ;;  %6259 = vmatprep.subr.msk.bf16.mxu0 %vm7060_vm2, %v6257_v47 }
 0x1b1   : > { %5769 = vmatmul.mubr.msk.f32.vlgmr.msra.gmra.mrb[12].mxu1 %vm1278_vm1, %v5646_v30  ;;  %6265 = vmatprep.subr.msk.bf16.mxu1 %vm7060_vm2, %v6263_v49 }
 0x1b2   : > { %6262 = vmatpush3.bf16.xpose.msk.msra.mxu0 %vm7060_vm2, %v6257_v47  ;;  %5775 = vmatprep.mubr.msk.f32.mxu0 %vm1278_vm1, %v594_v35 }
 0x1b3   : > { %6268 = vmatpush3.bf16.xpose.msk.msra.mxu1 %vm7060_vm2, %v6263_v49  ;;  %5782 = vmatprep.mubr.msk.f32.mxu1 %vm1278_vm1, %v669_v36 }
 0x1b4   : > { %v5723_v50 = vpop.f32.mrb[8].mxu0 }
 0x1b5   : > { %v5734_v51 = vpop.f32.mrb[8].mxu1  ;;  %v1044_v52 = vpop.f32.mrb[9].mxu0 }
 0x1b6   : > { %v6269_v53 = vpack.c.bf16 %v5723_v50, %v1044_v52  ;;  %v1119_v54 = vpop.f32.mrb[9].mxu1 }
 0x1b7   : > { %v7084_v55 = vpack.c.bf16 %v5734_v51, %v1119_v54 }
 0x1b8   : > { %6270 = vmatprep.subr.bf16.mxu0 %v6269_v53 }
 0x1b9   : > { %5776 = vmatmul.mubr.msk.f32.vlgmr.msra.gmra.mrb[14].mxu0 %vm1278_vm1, %v5657_v33 }
 0x1ba   : > { %5783 = vmatmul.mubr.msk.f32.vlgmr.msra.gmra.mrb[14].mxu1 %vm1278_vm1, %v5668_v34  ;;  %6272 = vmatpush3.bf16.msra.mxu0 %v6269_v53 }
 0x1bb   : > { %6274 = vmatprep.subr.bf16.mxu0 %v7084_v55 }
 0x1bc   : > { %v5745_v56 = vpop.f32.mrb[10].mxu0 }
 0x1bd   : > { %v5756_v57 = vpop.f32.mrb[10].mxu1  ;;  %v1194_v58 = vpop.f32.mrb[11].mxu0 }
 0x1be   : > { %v7089_v59 = vpack.c.bf16 %v5745_v56, %v1194_v58  ;;  %v1269_v60 = vpop.f32.mrb[11].mxu1 }
 0x1bf   : > { %v6281_v61 = vpack.c.bf16 %v5756_v57, %v1269_v60 }
 0x1c1   : > { %6282 = vmatprep.subr.bf16.mxu1 %v6281_v61 }
 0x1c2   : > { %6284 = vmatpush3.bf16.msra.mxu1 %v6281_v61 }
 0x283   : > { %v5763_v63 = vpop.f32.mrb[12].mxu0 }
 0x284   : > { %v5770_v4 = vpop.f32.mrb[12].mxu1  ;;  %v1357_v5 = vpop.f32.mrb[13].mxu0  ;;  %v1363_v9 = vadd.f32 %v5763_v63, %v7103_v3 }
 0x285   : > { %v1358_v6 = vadd.f32 %v1357_v5, %v7099_v62  ;;  %v1444_v7 = vpop.f32.mrb[13].mxu1  ;;  %v1450_v13 = vadd.f32 %v5770_v4, %v7109_v11 }
 0x286   : > { %v1445_v8 = vadd.f32 %v1444_v7, %v277_v2  ;;  %v1631_v15 = vsel %vm1627_vm3, %v1363_v9, -inf }
 0x287   : > { %v1628_v10 = vsel %vm1627_vm3, %v1358_v6, -inf  ;;  %v1637_v24 = vsel %vm1627_vm3, %v1450_v13, -inf }
 0x288   : > { %v1634_v12 = vsel %vm1627_vm3, %v1445_v8, -inf  ;;  %1629 = vmax.xlane.f32.xlu1 %v1628_v10 }
 0x289   : > { %1635 = vmax.xlane.f32.xlu0 %v1634_v12 }
 0x28c   : > { %v5777_v17 = vpop.f32.mrb[14].mxu0  ;;  %1632 = vmax.xlane.f32.xlu1 %v1631_v15 }
 0x28d   : > { %v5784_v18 = vpop.f32.mrb[14].mxu1  ;;  %v1531_v19 = vpop.f32.mrb[15].mxu0  ;;  %v1537_v23 = vadd.f32 %v5777_v17, %v7118_v16 }
 0x28e   : > { %v1532_v21 = vadd.f32 %v1531_v19, %v7114_v14  ;;  %v1618_v22 = vpop.f32.mrb[15].mxu1  ;;  %v1624_v28 = vadd.f32 %v5784_v18, %v7127_v25  ;;  %v335_v18 = vld [vmem:[%s7793_s3 + $0x1a0] sm:$0xff]  ;;  %v336_v19 = vld [vmem:[%s7793_s3 + $0x1a8] sm:$0xff] }
 0x28f   : > { %v1619_v26 = vadd.f32 %v1618_v22, %v7121_v20  ;;  %v1643_v29 = vsel %vm1627_vm3, %v1537_v23, -inf }
 0x290   : > { %v1640_v27 = vsel %vm1627_vm3, %v1532_v21, -inf  ;;  %1638 = vmax.xlane.f32.xlu1 %v1637_v24  ;;  %v1649_v31 = vsel %vm1627_vm3, %v1624_v28, -inf }
 0x291   : > { %1641 = vmax.xlane.f32.xlu0 %v1640_v27  ;;  %v1646_v30 = vsel %vm1627_vm3, %v1619_v26, -inf }
 0x294   : > { %1644 = vmax.xlane.f32.xlu1 %v1643_v29 }
 0x295   : > { %1647 = vmax.xlane.f32.xlu0 %v1646_v30 }
 0x298   : > { %1650 = vmax.xlane.f32.xlu1 %v1649_v31 }
 0x315   : > { %v1630_v32 = vpop.xlane.xlu1 %1629 }
 0x316   : > { %v1636_v33 = vpop.xlane.xlu0 %1635  ;;  %v1652_v34 = vsub.f32 %v1358_v6, %v1630_v32 }
 0x317   : > { %v1654_v35 = vsub.f32 %v1445_v8, %v1636_v33 }
 0x318   : > { %v1660_v36 = vmul.f32 1.442695, %v1652_v34 }
 0x319   : > { %v1664_v37 = vmul.f32 1.442695, %v1654_v35  ;;  %v1633_v38 = vpop.xlane.xlu1 %1632 }
 0x31a   : > { %6610 = vpow2.f32 %v1660_v36  ;;  %v1653_v39 = vsub.f32 %v1363_v9, %v1633_v38  ;;  %v332_v38 = vld [vmem:[%s7793_s3 + $0x188] sm:$0xff] }
 0x31b   : > { %6612 = vpow2.f32 %v1664_v37  ;;  %v331_v37 = vld [vmem:[%s7793_s3 + $0x180] sm:$0xff] }
 0x31c   : > { %v1662_v41 = vmul.f32 1.442695, %v1653_v39 }
 0x31d   : > { %v1639_v42 = vpop.xlane.xlu1 %1638 }
 0x31e   : > { %6614 = vpow2.f32 %v1662_v41  ;;  %v1642_v43 = vpop.xlane.xlu0 %1641  ;;  %v1655_v44 = vsub.f32 %v1450_v13, %v1639_v42 }
 0x31f   : > { %v1656_v45 = vsub.f32 %v1532_v21, %v1642_v43  ;;  %v6297_v21 = vpack.c.bf16 %v336_v19, %v335_v18 }
 0x320   : > { %v1666_v46 = vmul.f32 1.442695, %v1655_v44  ;;  %v6285_v44 = vpack.c.bf16 %v332_v38, %v331_v37 }
 0x321   : > { %v1668_v47 = vmul.f32 1.442695, %v1656_v45  ;;  %v1645_v48 = vpop.xlane.xlu1 %1644  ;;  %6299 = vmatprep.subr.msk.bf16.mxu1 %vm7060_vm2, %v6297_v21 }
 0x322   : > { %6616 = vpow2.f32 %v1666_v46  ;;  %v1648_v49 = vpop.xlane.xlu0 %1647  ;;  %v1657_v50 = vsub.f32 %v1537_v23, %v1645_v48 }
 0x323   : > { %6618 = vpow2.f32 %v1668_v47  ;;  %v1658_v51 = vsub.f32 %v1619_v26, %v1648_v49  ;;  %v338_v49 = vld [vmem:[%s7793_s3 + $0x1b8] sm:$0xff] }
 0x324   : > { %v6611_v52 = vpop.eup %6610  ;;  %v1670_v53 = vmul.f32 1.442695, %v1657_v50 }
 0x325   : > { %v1672_v54 = vmul.f32 1.442695, %v1658_v51  ;;  %v1651_v56 = vpop.xlane.xlu1 %1650  ;;  %v1676_v57 = vsel %vm1627_vm3, %v6611_v52, 0.0  ;;  %v6613_v58 = vpop.eup %6612  ;;  %v334_v51 = vld [vmem:[%s7793_s3 + $0x198] sm:$0xff] }
 0x326   : > { %6620 = vpow2.f32 %v1670_v53  ;;  %v1659_v60 = vsub.f32 %v1624_v28, %v1651_v56  ;;  %1677 = vadd.xlane.f32.xlu0 %v1676_v57  ;;  %v1682_v2 = vsel %vm1627_vm3, %v6613_v58, 0.0  ;;  %v339_v56 = vld [vmem:[%s7793_s3 + $0x1c0] sm:$0xff]  ;;  %v340_v57 = vld [vmem:[%s7793_s3 + $0x1c8] sm:$0xff] }
 0x327   : > { %6622 = vpow2.f32 %v1672_v54 }
 0x328   : > { %v6615_v61 = vpop.eup %6614  ;;  %v1674_v63 = vmul.f32 1.442695, %v1659_v60  ;;  %v343_v60 = vld [vmem:[%s7793_s3 + $0x1e0] sm:$0xff] }
 0x329   : > { %v1679_v4 = vsel %vm1627_vm3, %v6615_v61, 0.0 }
 0x32a   : > { %6624 = vpow2.f32 %v1674_v63  ;;  %1683 = vadd.xlane.f32.xlu0 %v1682_v2  ;;  %1680 = vadd.xlane.f32.xlu1 %v1679_v4  ;;  %v341_v2 = vld [vmem:[%s7793_s3 + $0x1d0] sm:$0xff]  ;;  %v342_v4 = vld [vmem:[%s7793_s3 + $0x1d8] sm:$0xff] }
 0x32c   : > { %v6617_v5 = vpop.eup %6616 }
 0x32d   : > { %v6619_v6 = vpop.eup %6618  ;;  %v1685_v7 = vsel %vm1627_vm3, %v6617_v5, 0.0 }
 0x32e   : > { %v1688_v8 = vsel %vm1627_vm3, %v6619_v6, 0.0  ;;  %1686 = vadd.xlane.f32.xlu1 %v1685_v7  ;;  %v6315_v7 = vpack.c.bf16 %v342_v4, %v341_v2 }
 0x32f   : > { %1689 = vadd.xlane.f32.xlu0 %v1688_v8  ;;  %v345_v8 = vld [vmem:[%s7793_s3 + $0x1f0] sm:$0xff] }
 0x330   : > { %v6621_v9 = vpop.eup %6620 }
 0x331   : > { %v6623_v10 = vpop.eup %6622  ;;  %v1691_v12 = vsel %vm1627_vm3, %v6621_v9, 0.0 }
 0x332   : > { %v1694_v13 = vsel %vm1627_vm3, %v6623_v10, 0.0  ;;  %1692 = vadd.xlane.f32.xlu1 %v1691_v12 }
 0x333   : > { %1695 = vadd.xlane.f32.xlu0 %v1694_v13 }
 0x334   : > { %v6625_v15 = vpop.eup %6624 }
 0x335   : > { %v1697_v17 = vsel %vm1627_vm3, %v6625_v15, 0.0 }
 0x336   : > { %1698 = vadd.xlane.f32.xlu1 %v1697_v17 }
 0x3b3   : > { %v1678_v22 = vpop.xlane.xlu0 %1677 }
 0x3b4   : > { %6626 = vrcp.f32 %v1678_v22 }
 0x3b7   : > { %v1684_v23 = vpop.xlane.xlu0 %1683  ;;  %v1681_v24 = vpop.xlane.xlu1 %1680 }
 0x3b8   : > { %6628 = vrcp.f32 %v1684_v23 }
 0x3b9   : > { %6630 = vrcp.f32 %v1681_v24 }
 0x3bb   : > { %v1687_v26 = vpop.xlane.xlu1 %1686 }
 0x3bc   : > { %v1690_v27 = vpop.xlane.xlu0 %1689  ;;  %6632 = vrcp.f32 %v1687_v26 }
 0x3bd   : > { %6634 = vrcp.f32 %v1690_v27 }
 0x3be   : > { %v6627_v28 = vpop.eup %6626 }
 0x3bf   : > { %v1693_v29 = vpop.xlane.xlu1 %1692  ;;  %v1708_v30 = vmul.f32 %v6627_v28, %v6611_v52 }
 0x3c0   : > { %v1696_v31 = vpop.xlane.xlu0 %1695  ;;  %6636 = vrcp.f32 %v1693_v29 }
 0x3c1   : > { %6638 = vrcp.f32 %v1696_v31  ;;  %5789 = vmatprep.mubr.msk.f32.mxu0 %vm1627_vm3, %v1708_v30 }
 0x3c2   : > { %v6629_v32 = vpop.eup %6628 }
 0x3c3   : > { %v6631_v33 = vpop.eup %6630  ;;  %v1699_v34 = vpop.xlane.xlu1 %1698  ;;  %v1710_v35 = vmul.f32 %v6629_v32, %v6613_v58  ;;  %v6309_v58 = vpack.c.bf16 %v340_v57, %v339_v56  ;;  %v2540_v56 = vld [vmem:[%s7795_s5 + $0x10] sm:$0xff] }
 0x3c4   : > { %v1709_v36 = vmul.f32 %v6631_v33, %v6615_v61  ;;  %6640 = vrcp.f32 %v1699_v34  ;;  %v344_v61 = vld [vmem:[%s7793_s3 + $0x1e8] sm:$0xff] }
 0x3c5   : > { %v6321_v63 = vpack.c.bf16 %v344_v61, %v343_v60  ;;  %v2542_v61 = vld [vmem:[%s7795_s5 + $0x20] sm:$0xff] }
 0x3c6   : > { %v6633_v39 = vpop.eup %6632  ;;  %5790 = vmatmul.mubr.msk.f32.vlgmr.msra.gmra.mrb[16].mxu0 %vm1627_vm3, %v1709_v36 }
 0x3c7   : > { %v6635_v41 = vpop.eup %6634  ;;  %v1711_v42 = vmul.f32 %v6633_v39, %v6617_v5  ;;  %6276 = vmatpush3.bf16.msra.mxu0 %v7084_v55  ;;  %5796 = vmatprep.mubr.msk.f32.mxu0 %vm1627_vm3, %v1710_v35  ;;  %v337_v55 = vld [vmem:[%s7793_s3 + $0x1b0] sm:$0xff] }
 0x3c8   : > { %6278 = vmatprep.subr.bf16.mxu0 %v7089_v59  ;;  %v1712_v43 = vmul.f32 %v6635_v41, %v6619_v6  ;;  %v6303_v53 = vpack.c.bf16 %v338_v49, %v337_v55 }
 0x3ca   : > { %v6637_v45 = vpop.eup %6636  ;;  %5797 = vmatmul.mubr.msk.f32.vlgmr.msra.gmra.mrb[18].mxu0 %vm1627_vm3, %v1711_v42 }
 0x3cb   : > { %v6639_v46 = vpop.eup %6638  ;;  %v1713_v47 = vmul.f32 %v6637_v45, %v6621_v9  ;;  %6280 = vmatpush3.bf16.msra.mxu0 %v7089_v59  ;;  %5803 = vmatprep.mubr.msk.f32.mxu0 %vm1627_vm3, %v1712_v43  ;;  %v333_v59 = vld [vmem:[%s7793_s3 + $0x190] sm:$0xff]  ;;  %v346_v9 = vld [vmem:[%s7793_s3 + $0x1f8] sm:$0xff] }
 0x3cc   : > { %v1714_v48 = vmul.f32 %v6639_v46, %v6623_v10  ;;  %6287 = vmatprep.subr.msk.bf16.mxu0 %vm7060_vm2, %v6285_v44  ;;  %v6291_v54 = vpack.c.bf16 %v334_v51, %v333_v59  ;;  %v6327_v13 = vpack.c.bf16 %v346_v9, %v345_v8  ;;  %v2454_v51 = vld [vmem:[%s7794_s4 + $0x18] sm:$0xff] }
 0x3ce   : > { %v6641_v50 = vpop.eup %6640  ;;  %5804 = vmatmul.mubr.msk.f32.vlgmr.msra.gmra.mrb[20].mxu0 %vm1627_vm3, %v1713_v47  ;;  %5810 = vmatprep.mubr.msk.f32.mxu1 %vm1627_vm3, %v1714_v48 }
 0x3cf   : > { %v1715_v52 = vmul.f32 %v6641_v50, %v6625_v15  ;;  %v2453_v50 = vld [vmem:[%s7794_s4 + $0x10] sm:$0xff] }
 0x3d1   : > { %5811 = vmatmul.mubr.msk.f32.vlgmr.msra.gmra.mrb[16].mxu1 %vm1627_vm3, %v1715_v52  ;;  %v6337_v52 = vpack.c.bf16 %v2454_v51, %v2453_v50 }
 0x3d2   : > { %6302 = vmatpush3.bf16.xpose.msk.msra.mxu1 %vm7060_vm2, %v6297_v21 }
 0x3d3   : > { %6305 = vmatprep.subr.msk.bf16.mxu1 %vm7060_vm2, %v6303_v53 }
 0x3d4   : > { %6290 = vmatpush3.bf16.xpose.msk.msra.mxu0 %vm7060_vm2, %v6285_v44 }
 0x3d5   : > { %6293 = vmatprep.subr.msk.bf16.mxu0 %vm7060_vm2, %v6291_v54 }
 0x3da   : > { %6308 = vmatpush3.bf16.xpose.msk.msra.mxu1 %vm7060_vm2, %v6303_v53  ;;  %v2538_v53 = vld [vmem:[%s7795_s5] sm:$0xff] }
 0x3db   : > { %6323 = vmatprep.subr.msk.bf16.mxu1 %vm7060_vm2, %v6321_v63 }
 0x3dc   : > { %6296 = vmatpush3.bf16.xpose.msk.msra.mxu0 %vm7060_vm2, %v6291_v54  ;;  %v2539_v54 = vld [vmem:[%s7795_s5 + $0x8] sm:$0xff] }
 0x3dd   : > { %6311 = vmatprep.subr.msk.bf16.mxu0 %vm7060_vm2, %v6309_v58  ;;  %v6341_v57 = vpack.c.bf16 %v2539_v54, %v2538_v53 }
 0x499   : > { %v5791_v5 = vpop.f32.mrb[16].mxu0 }
 0x49a   : > { %v1788_v6 = vpop.f32.mrb[17].mxu0 }
 0x49b   : > { %5821 = vmatprep.mubr.msk.f32.mxu0 %vm1278_vm1, %v1788_v6 }
 0x49c   : > { %5822 = vmatmul.mubr.msk.f32.vlgmr.msra.gmra.mrb[22].mxu0 %vm1278_vm1, %v5791_v5 }
 0x49d   : > { %6314 = vmatpush3.bf16.xpose.msk.msra.mxu0 %vm7060_vm2, %v6309_v58  ;;  %v5798_v10 = vpop.f32.mrb[18].mxu0  ;;  %v2541_v58 = vld [vmem:[%s7795_s5 + $0x18] sm:$0xff] }
 0x49e   : > { %v1869_v12 = vpop.f32.mrb[19].mxu0  ;;  %6317 = vmatprep.subr.msk.bf16.mxu0 %vm7060_vm2, %v6315_v7  ;;  %v6345_v60 = vpack.c.bf16 %v2541_v58, %v2540_v56 }
 0x49f   : > { %5832 = vmatprep.mubr.msk.f32.mxu1 %vm1278_vm1, %v1869_v12 }
 0x4a0   : > { %5833 = vmatmul.mubr.msk.f32.vlgmr.msra.gmra.mrb[18].mxu1 %vm1278_vm1, %v5798_v10 }
 0x4a1   : > { %6326 = vmatpush3.bf16.xpose.msk.msra.mxu1 %vm7060_vm2, %v6321_v63  ;;  %v5805_v15 = vpop.f32.mrb[20].mxu0  ;;  %v2543_v63 = vld [vmem:[%s7795_s5 + $0x28] sm:$0xff] }
 0x4a2   : > { %v1950_v17 = vpop.f32.mrb[21].mxu0  ;;  %6329 = vmatprep.subr.msk.bf16.mxu1 %vm7060_vm2, %v6327_v13  ;;  %v6349_v2 = vpack.c.bf16 %v2543_v63, %v2542_v61  ;;  %v5239_v63 = vld [vmem:[%s7792_s2 + $0x1] ss:$0 sm:$0xff] }
 0x4a3   : > { %5843 = vmatprep.mubr.msk.f32.mxu0 %vm1278_vm1, %v1950_v17 }
 0x4a4   : > { %v5812_v18 = vpop.f32.mrb[16].mxu1 }
 0x4a5   : > { %6320 = vmatpush3.bf16.xpose.msk.msra.mxu0 %vm7060_vm2, %v6315_v7  ;;  %v2031_v19 = vpop.f32.mrb[17].mxu1 }
 0x4a6   : > { %5854 = vmatprep.mubr.msk.f32.mxu1 %vm1278_vm1, %v2031_v19 }
 0x4a9   : > { %6332 = vmatpush3.bf16.xpose.msk.msra.mxu1 %vm7060_vm2, %v6327_v13  ;;  %v5170_v13 = vld [vmem:[%s7792_s2 + $0x2] ss:$0 sm:$0xff] }
 0x4aa   : > { %6342 = vmatprep.subr.bf16.mxu1 %v6341_v57 }
 0x4ac   : > { %5844 = vmatmul.mubr.msk.f32.vlgmr.msra.gmra.mrb[24].mxu0 %vm1278_vm1, %v5805_v15 }
 0x4b0   : > { %5855 = vmatmul.mubr.msk.f32.vlgmr.msra.gmra.mrb[20].mxu1 %vm1278_vm1, %v5812_v18 }
 0x4b1   : > { %6344 = vmatpush3.bf16.msra.mxu1 %v6341_v57 }
 0x4b2   : > { %6346 = vmatprep.subr.bf16.mxu1 %v6345_v60 }
 0x4b5   : > { %6348 = vmatpush3.bf16.msra.mxu1 %v6345_v60 }
 0x4b6   : > { %6350 = vmatprep.subr.bf16.mxu1 %v6349_v2 }
 0x4b9   : > { %6352 = vmatpush3.bf16.msra.mxu1 %v6349_v2 }
 0x56f   : > { %v5823_v21 = vpop.f32.mrb[22].mxu0 }
 0x570   : > { %v2124_v22 = vpop.f32.mrb[23].mxu0  ;;  %v2419_v24 = vsel %vm350_vm0, %v5823_v21, 0.0  ;;  %v2544_v21 = vld [vmem:[%s7795_s5 + $0x30] sm:$0xff] }
 0x571   : > { %v2412_v28 = vsel %vm350_vm0, %v2124_v22, 0.0  ;;  %v2545_v22 = vld [vmem:[%s7795_s5 + $0x38] sm:$0xff] }
 0x573   : > { %v5834_v23 = vpop.f32.mrb[18].mxu1 }
 0x574   : > { %v2420_v26 = vsel %vm350_vm0, %v5834_v23, 0.0  ;;  %v2217_v27 = vpop.f32.mrb[19].mxu1  ;;  %v6353_v23 = vpack.c.bf16 %v2545_v22, %v2544_v21 }
 0x575   : > { %v2421_v29 = vadd.f32 %v2420_v26, %v2419_v24  ;;  %v2413_v30 = vsel %vm350_vm0, %v2217_v27, 0.0 }
 0x576   : > { %v2414_v31 = vadd.f32 %v2413_v30, %v2412_v28  ;;  %6354 = vmatprep.subr.bf16.mxu1 %v6353_v23 }
 0x577   : > { %6356 = vmatpush3.bf16.msra.mxu1 %v6353_v23  ;;  %v5189_v23 = vld [vmem:[%s7793_s3 + $0x270] sm:$0xff] }
 0x57f   : > { %v5845_v32 = vpop.f32.mrb[24].mxu0 }
 0x580   : > { %v2422_v33 = vsel %vm350_vm0, %v5845_v32, 0.0  ;;  %v2310_v34 = vpop.f32.mrb[25].mxu0 }
 0x581   : > { %v2423_v35 = vadd.f32 %v2422_v33, %v2421_v29  ;;  %v2415_v36 = vsel %vm350_vm0, %v2310_v34, 0.0 }
 0x582   : > { %v2416_v37 = vadd.f32 %v2415_v36, %v2414_v31 }
 0x583   : > { %v5856_v38 = vpop.f32.mrb[20].mxu1 }
 0x584   : > { %v2424_v39 = vsel %vm350_vm0, %v5856_v38, 0.0  ;;  %v2403_v41 = vpop.f32.mrb[21].mxu1  ;;  %v5176_v38 = vld [vmem:[%s7793_s3 + $0x208] sm:$0xff] }
 0x585   : > { %v2425_v42 = vadd.f32 %v2424_v39, %v2423_v35  ;;  %v2417_v43 = vsel %vm350_vm0, %v2403_v41, 0.0  ;;  %v5183_v39 = vld [vmem:[%s7793_s3 + $0x240] sm:$0xff] }
 0x586   : > { %v2418_v44 = vadd.f32 %v2417_v43, %v2416_v37  ;;  %v5175_v37 = vld [vmem:[%s7793_s3 + $0x200] sm:$0xff] }
 0x587   : > { %v7251_v45 = vadd.f32 %v2425_v42, %v6847_v1  ;;  %v2451_v1 = vld [vmem:[%s7794_s4] sm:$0xff]  ;;  %v6357_v41 = vpack.c.bf16 %v5176_v38, %v5175_v37  ;;  %v5184_v42 = vld [vmem:[%s7793_s3 + $0x248] sm:$0xff]  ;;  %v5197_v38 = vld [vmem:[%s7793_s3 + $0x2b0] sm:$0xff] }
 0x588   : > { %v7254_v46 = vadd.f32 %v2418_v44, %v6845_v0  ;;  %v2452_v0 = vld [vmem:[%s7794_s4 + $0x8] sm:$0xff]  ;;  %v6373_v43 = vpack.c.bf16 %v5184_v42, %v5183_v39  ;;  %v5177_v44 = vld [vmem:[%s7793_s3 + $0x210] sm:$0xff]  ;;  %v5198_v39 = vld [vmem:[%s7793_s3 + $0x2b8] sm:$0xff] }
 0x589   : > { %v2430_v47 = vmul.f32 %v7251_v45, %v7251_v45  ;;  %v6333_v59 = vpack.c.bf16 %v2452_v0, %v2451_v1  ;;  %v5180_v1 = vld [vmem:[%s7793_s3 + $0x228] sm:$0xff]  ;;  %v5191_v0 = vld [vmem:[%s7793_s3 + $0x280] sm:$0xff]  ;;  %v5210_v42 = vld [vmem:[%s7793_s3 + $0x318] sm:$0xff] }
 0x58a   : > { %v2429_v48 = vmul.f32 %v7254_v46, %v7254_v46  ;;  %6374 = vmatprep.subr.bf16.mxu1 %v6373_v43 }
 0x58b   : > { %v2434_v55 = vsel %vm350_vm0, %v2430_v47, 0.0  ;;  %6334 = vmatprep.subr.bf16.mxu0 %v6333_v59 }
 0x58c   : > { %2435 = vadd.xlane.f32.xlu1 %v2434_v55  ;;  %v2431_v49 = vsel %vm350_vm0, %v2429_v48, 0.0  ;;  %6336 = vmatpush3.bf16.msra.mxu0 %v6333_v59  ;;  %v5186_v48 = vld [vmem:[%s7793_s3 + $0x258] sm:$0xff]  ;;  %v5192_v59 = vld [vmem:[%s7793_s3 + $0x288] sm:$0xff] }
 0x58d   : > { %2432 = vadd.xlane.f32.xlu0 %v2431_v49  ;;  %6338 = vmatprep.subr.bf16.mxu0 %v6337_v52  ;;  %v5179_v49 = vld [vmem:[%s7793_s3 + $0x220] sm:$0xff]  ;;  %v6389_v51 = vpack.c.bf16 %v5192_v59, %v5191_v0  ;;  %v5206_v0 = vld [vmem:[%s7793_s3 + $0x2f8] sm:$0xff] }
 0x58e   : > { %v6365_v50 = vpack.c.bf16 %v5180_v1, %v5179_v49  ;;  %v5205_v1 = vld [vmem:[%s7793_s3 + $0x2f0] sm:$0xff]  ;;  %v5218_v59 = vld [vmem:[%s7793_s3 + $0x358] sm:$0xff] }
 0x590   : > { %6340 = vmatpush3.bf16.msra.mxu0 %v6337_v52 }
 0x591   : > { %6358 = vmatprep.subr.bf16.mxu0 %v6357_v41 }
 0x619   : > { %v2436_v4 = vpop.xlane.xlu1 %2435 }
 0x61a   : > { %v2438_v5 = vmul.f32 0.03125, %v2436_v4  ;;  %v2433_v6 = vpop.xlane.xlu0 %2432 }
 0x61b   : > { %v2437_v7 = vmul.f32 0.03125, %v2433_v6  ;;  %v5182_v6 = vld [vmem:[%s7793_s3 + $0x238] sm:$0xff] }
 0x61c   : > { %v2440_v8 = vadd.f32 1e-06, %v2438_v5  ;;  %v5181_v5 = vld [vmem:[%s7793_s3 + $0x230] sm:$0xff] }
 0x61d   : > { %v2439_v9 = vadd.f32 1e-06, %v2437_v7  ;;  %v5193_v7 = vld [vmem:[%s7793_s3 + $0x290] sm:$0xff] }
 0x61e   : > { %6642 = vrsqrt.f32 %v2440_v8  ;;  %v5194_v8 = vld [vmem:[%s7793_s3 + $0x298] sm:$0xff] }
 0x61f   : > { %6644 = vrsqrt.f32 %v2439_v9 }
 0x628   : > { %v6643_v10 = vpop.eup %6642 }
 0x629   : > { %v6645_v12 = vpop.eup %6644  ;;  %v2444_v15 = vmul.f32 %v6643_v10, %v7251_v45 }
 0x62a   : > { %v2443_v17 = vmul.f32 %v6645_v12, %v7254_v46  ;;  %v5187_v12 = vld [vmem:[%s7793_s3 + $0x260] sm:$0xff] }
 0x62b   : > { %v2450_v19 = vmul.f32 %v5170_v13, %v2444_v15  ;;  %v6393_v15 = vpack.c.bf16 %v5194_v8, %v5193_v7 }
 0x62c   : > { %v2449_v18 = vmul.f32 %v5170_v13, %v2443_v17  ;;  %v6369_v13 = vpack.c.bf16 %v5182_v6, %v5181_v5  ;;  %v5188_v17 = vld [vmem:[%s7793_s3 + $0x268] sm:$0xff]  ;;  %v5222_v5 = vld [vmem:[%s7793_s3 + $0x378] sm:$0xff] }
 0x62d   : > { %v6381_v21 = vpack.c.bf16 %v5188_v17, %v5187_v12 }
 0x62e   : > { %5865 = vmatprep.mubr.msk.f32.mxu0 %vm350_vm0, %v2449_v18  ;;  %v5199_v18 = vld [vmem:[%s7793_s3 + $0x2c0] sm:$0xff] }
 0x62f   : > { %5866 = vmatmul.mubr.msk.f32.vlgmr.msra.gmra.mrb[26].mxu0 %vm350_vm0, %v2450_v19  ;;  %v5200_v19 = vld [vmem:[%s7793_s3 + $0x2c8] sm:$0xff] }
 0x630   : > { %6360 = vmatpush3.bf16.msra.mxu0 %v6357_v41  ;;  %v6405_v22 = vpack.c.bf16 %v5200_v19, %v5199_v18  ;;  %v5209_v41 = vld [vmem:[%s7793_s3 + $0x310] sm:$0xff] }
 0x702   : > { %v5867_v24 = vpop.f32.mrb[26].mxu0 }
 0x703   : > { %v2527_v26 = vpop.f32.mrb[27].mxu0  ;;  %v2537_v28 = vmax.f32 %v5867_v24, 0.0  ;;  %v5190_v24 = vld [vmem:[%s7793_s3 + $0x278] sm:$0xff] }
 0x704   : > { %v2536_v27 = vmax.f32 %v2527_v26, 0.0  ;;  %v5201_v26 = vld [vmem:[%s7793_s3 + $0x2d0] sm:$0xff] }
 0x706   : > { %5884 = vmatprep.mubr.msk.f32.mxu1 %vm2546_vm4, %v2536_v27  ;;  %v5202_v27 = vld [vmem:[%s7793_s3 + $0x2d8] sm:$0xff] }
 0x707   : > { %5885 = vmatmul.mubr.msk.f32.vlgmr.msra.gmra.mrb[22].mxu1 %vm2546_vm4, %v2537_v28  ;;  %v6385_v28 = vpack.c.bf16 %v5190_v24, %v5189_v23 }
 0x708   : > { %6376 = vmatpush3.bf16.msra.mxu1 %v6373_v43  ;;  %v6401_v43 = vpack.c.bf16 %v5198_v39, %v5197_v38 }
 0x7da   : > { %v5886_v29 = vpop.f32.mrb[22].mxu1 }
 0x7db   : > { %v7308_v30 = vadd.f32 %v5886_v29, %v7251_v45  ;;  %v2619_v31 = vpop.f32.mrb[23].mxu1  ;;  %v5178_v45 = vld [vmem:[%s7793_s3 + $0x218] sm:$0xff]  ;;  %v6409_v29 = vpack.c.bf16 %v5202_v27, %v5201_v26 }
 0x7dc   : > { %v7311_v32 = vadd.f32 %v2619_v31, %v7254_v46  ;;  %v5185_v46 = vld [vmem:[%s7793_s3 + $0x250] sm:$0xff]  ;;  %v6361_v47 = vpack.c.bf16 %v5178_v45, %v5177_v44  ;;  %v5195_v31 = vld [vmem:[%s7793_s3 + $0x2a0] sm:$0xff]  ;;  %v5204_v45 = vld [vmem:[%s7793_s3 + $0x2e8] sm:$0xff] }
 0x7dd   : > { %v2697_v33 = vmul.f32 %v7308_v30, %v7308_v30  ;;  %v6377_v55 = vpack.c.bf16 %v5186_v48, %v5185_v46  ;;  %v5203_v44 = vld [vmem:[%s7793_s3 + $0x2e0] sm:$0xff]  ;;  %v6425_v46 = vpack.c.bf16 %v5210_v42, %v5209_v41  ;;  %v5216_v48 = vld [vmem:[%s7793_s3 + $0x348] sm:$0xff] }
 0x7de   : > { %v2696_v34 = vmul.f32 %v7311_v32, %v7311_v32  ;;  %6362 = vmatprep.subr.bf16.mxu0 %v6361_v47 }
 0x7df   : > { %v2701_v35 = vsel %vm350_vm0, %v2697_v33, 0.0  ;;  %6378 = vmatprep.subr.bf16.mxu1 %v6377_v55  ;;  %6364 = vmatpush3.bf16.msra.mxu0 %v6361_v47  ;;  %v5196_v33 = vld [vmem:[%s7793_s3 + $0x2a8] sm:$0xff]  ;;  %v5215_v47 = vld [vmem:[%s7793_s3 + $0x340] sm:$0xff] }
 0x7e0   : > { %2702 = vadd.xlane.f32.xlu1 %v2701_v35  ;;  %v2698_v36 = vsel %vm350_vm0, %v2696_v34, 0.0  ;;  %6380 = vmatpush3.bf16.msra.mxu1 %v6377_v55  ;;  %v5207_v34 = vld [vmem:[%s7793_s3 + $0x300] sm:$0xff]  ;;  %v5208_v35 = vld [vmem:[%s7793_s3 + $0x308] sm:$0xff]  ;;  %v6413_v55 = vpack.c.bf16 %v5204_v45, %v5203_v44  ;;  %v6437_v49 = vpack.c.bf16 %v5216_v48, %v5215_v47 }
 0x7e1   : > { %2699 = vadd.xlane.f32.xlu0 %v2698_v36  ;;  %6366 = vmatprep.subr.bf16.mxu0 %v6365_v50  ;;  %v6397_v36 = vpack.c.bf16 %v5196_v33, %v5195_v31  ;;  %v6421_v37 = vpack.c.bf16 %v5208_v35, %v5207_v34 }
 0x7e2   : > { %6390 = vmatprep.subr.bf16.mxu1 %v6389_v51 }
 0x86d   : > { %v2703_v52 = vpop.xlane.xlu1 %2702 }
 0x86e   : > { %v2705_v53 = vmul.f32 0.03125, %v2703_v52  ;;  %v2700_v54 = vpop.xlane.xlu0 %2699  ;;  %v5211_v52 = vld [vmem:[%s7793_s3 + $0x320] sm:$0xff] }
 0x86f   : > { %v2704_v56 = vmul.f32 0.03125, %v2700_v54 }
 0x870   : > { %v2707_v57 = vadd.f32 1e-06, %v2705_v53  ;;  %v5212_v53 = vld [vmem:[%s7793_s3 + $0x328] sm:$0xff] }
 0x871   : > { %v2706_v58 = vadd.f32 1e-06, %v2704_v56  ;;  %v6429_v56 = vpack.c.bf16 %v5212_v53, %v5211_v52 }
 0x872   : > { %6646 = vrsqrt.f32 %v2707_v57  ;;  %v5213_v57 = vld [vmem:[%s7793_s3 + $0x330] sm:$0xff] }
 0x873   : > { %6648 = vrsqrt.f32 %v2706_v58  ;;  %v5214_v58 = vld [vmem:[%s7793_s3 + $0x338] sm:$0xff] }
 0x87c   : > { %v6647_v60 = vpop.eup %6646 }
 0x87d   : > { %v6649_v61 = vpop.eup %6648  ;;  %v2711_v2 = vmul.f32 %v6647_v60, %v7308_v30  ;;  %v6433_v60 = vpack.c.bf16 %v5214_v58, %v5213_v57 }
 0x87e   : > { %v2710_v4 = vmul.f32 %v6649_v61, %v7311_v32  ;;  %v5219_v61 = vld [vmem:[%s7793_s3 + $0x360] sm:$0xff] }
 0x87f   : > { %v7374_v10 = vmul.f32 %v5239_v63, %v2711_v2 }
 0x880   : > { %v7372_v9 = vmul.f32 %v5239_v63, %v2710_v4  ;;  %v5220_v63 = vld [vmem:[%s7793_s3 + $0x368] sm:$0xff]  ;;  %v5221_v4 = vld [vmem:[%s7793_s3 + $0x370] sm:$0xff] }
 0x881   : > { %v6445_v2 = vpack.c.bf16 %v5220_v63, %v5219_v61  ;;  %v6449_v6 = vpack.c.bf16 %v5222_v5, %v5221_v4 }
 0x882   : > { %5895 = vmatprep.mubr.msk.f32.mxu0 %vm350_vm0, %v7372_v9  ;;  %5917 = vmatprep.mubr.msk.f32.mxu1 %vm350_vm0, %v7372_v9 }
 0x883   : > { %5896 = vmatmul.mubr.msk.f32.vlgmr.msra.gmra.mrb[28].mxu0 %vm350_vm0, %v7374_v10  ;;  %5918 = vmatmul.mubr.msk.f32.vlgmr.msra.gmra.mrb[24].mxu1 %vm350_vm0, %v7374_v10 }
 0x884   : > { %6368 = vmatpush3.bf16.msra.mxu0 %v6365_v50  ;;  %6392 = vmatpush3.bf16.msra.mxu1 %v6389_v51  ;;  %v5217_v50 = vld [vmem:[%s7793_s3 + $0x350] sm:$0xff]  ;;  %v6417_v51 = vpack.c.bf16 %v5206_v0, %v5205_v1 }
 0x885   : > { %5906 = vmatprep.mubr.msk.f32.mxu0 %vm350_vm0, %v7372_v9  ;;  %5939 = vmatprep.mubr.msk.f32.mxu1 %vm350_vm0, %v7372_v9  ;;  %v6441_v54 = vpack.c.bf16 %v5218_v59, %v5217_v50 }
 0x886   : > { %6370 = vmatprep.subr.bf16.mxu0 %v6369_v13  ;;  %6394 = vmatprep.subr.bf16.mxu1 %v6393_v15 }
 0x888   : > { %6372 = vmatpush3.bf16.msra.mxu0 %v6369_v13  ;;  %6396 = vmatpush3.bf16.msra.mxu1 %v6393_v15 }
 0x889   : > { %6382 = vmatprep.subr.bf16.mxu0 %v6381_v21  ;;  %6406 = vmatprep.subr.bf16.mxu1 %v6405_v22 }
 0x88b   : > { %5907 = vmatmul.mubr.msk.f32.vlgmr.msra.gmra.mrb[30].mxu0 %vm350_vm0, %v7374_v10  ;;  %5940 = vmatmul.mubr.msk.f32.vlgmr.msra.gmra.mrb[26].mxu1 %vm350_vm0, %v7374_v10 }
 0x88c   : > { %6384 = vmatpush3.bf16.msra.mxu0 %v6381_v21  ;;  %5928 = vmatprep.mubr.msk.f32.mxu0 %vm350_vm0, %v7372_v9 }
 0x88d   : > { %6408 = vmatpush3.bf16.msra.mxu1 %v6405_v22  ;;  %5961 = vmatprep.mubr.msk.f32.mxu1 %vm350_vm0, %v7372_v9 }
 0x88e   : > { %6386 = vmatprep.subr.bf16.mxu0 %v6385_v28  ;;  %6410 = vmatprep.subr.bf16.mxu1 %v6409_v29 }
 0x890   : > { %6388 = vmatpush3.bf16.msra.mxu0 %v6385_v28 }
 0x891   : > { %6412 = vmatpush3.bf16.msra.mxu1 %v6409_v29  ;;  %6398 = vmatprep.subr.bf16.mxu0 %v6397_v36 }
 0x892   : > { %6422 = vmatprep.subr.bf16.mxu1 %v6421_v37 }
 0x893   : > { %5929 = vmatmul.mubr.msk.f32.vlgmr.msra.gmra.mrb[32].mxu0 %vm350_vm0, %v7374_v10 }
 0x894   : > { %5962 = vmatmul.mubr.msk.f32.vlgmr.msra.gmra.mrb[28].mxu1 %vm350_vm0, %v7374_v10  ;;  %6400 = vmatpush3.bf16.msra.mxu0 %v6397_v36 }
 0x895   : > { %5950 = vmatprep.mubr.msk.f32.mxu0 %vm350_vm0, %v7372_v9  ;;  %6424 = vmatpush3.bf16.msra.mxu1 %v6421_v37 }
 0x896   : > { %5983 = vmatprep.mubr.msk.f32.mxu1 %vm350_vm0, %v7372_v9  ;;  %6402 = vmatprep.subr.bf16.mxu0 %v6401_v43 }
 0x897   : > { %6426 = vmatprep.subr.bf16.mxu1 %v6425_v46 }
 0x898   : > { %6404 = vmatpush3.bf16.msra.mxu0 %v6401_v43 }
 0x899   : > { %6428 = vmatpush3.bf16.msra.mxu1 %v6425_v46  ;;  %6414 = vmatprep.subr.bf16.mxu0 %v6413_v55 }
 0x89a   : > { %6438 = vmatprep.subr.bf16.mxu1 %v6437_v49 }
 0x89b   : > { %5951 = vmatmul.mubr.msk.f32.vlgmr.msra.gmra.mrb[34].mxu0 %vm350_vm0, %v7374_v10 }
 0x89c   : > { %5984 = vmatmul.mubr.msk.f32.vlgmr.msra.gmra.mrb[30].mxu1 %vm350_vm0, %v7374_v10  ;;  %6416 = vmatpush3.bf16.msra.mxu0 %v6413_v55 }
 0x89d   : > { %5972 = vmatprep.mubr.msk.f32.mxu0 %vm350_vm0, %v7372_v9  ;;  %6440 = vmatpush3.bf16.msra.mxu1 %v6437_v49 }
 0x89e   : > { %6005 = vmatprep.mubr.msk.f32.mxu1 %vm350_vm0, %v7372_v9  ;;  %6418 = vmatprep.subr.bf16.mxu0 %v6417_v51 }
 0x89f   : > { %6442 = vmatprep.subr.bf16.mxu1 %v6441_v54 }
 0x8a0   : > { %6420 = vmatpush3.bf16.msra.mxu0 %v6417_v51 }
 0x8a1   : > { %6444 = vmatpush3.bf16.msra.mxu1 %v6441_v54  ;;  %6430 = vmatprep.subr.bf16.mxu0 %v6429_v56  ;;  %v6690_v54 = vld [vmem:[%s7096_s11 + $0x10] sm:$0xff] }
 0x8a3   : > { %5973 = vmatmul.mubr.msk.f32.vlgmr.msra.gmra.mrb[36].mxu0 %vm350_vm0, %v7374_v10 }
 0x8a4   : > { %6006 = vmatmul.mubr.msk.f32.vlgmr.msra.gmra.mrb[32].mxu1 %vm350_vm0, %v7374_v10  ;;  %6432 = vmatpush3.bf16.msra.mxu0 %v6429_v56 }
 0x8a5   : > { %5994 = vmatprep.mubr.msk.f32.mxu0 %vm350_vm0, %v7372_v9  ;;  %6434 = vmatprep.subr.bf16.mxu0 %v6433_v60 }
 0x8a8   : > { %6436 = vmatpush3.bf16.msra.mxu0 %v6433_v60 }
 0x8a9   : > { %6446 = vmatprep.subr.bf16.mxu0 %v6445_v2 }
 0x8ab   : > { %5995 = vmatmul.mubr.msk.f32.vlgmr.msra.gmra.mrb[38].mxu0 %vm350_vm0, %v7374_v10 }
 0x8ac   : > { %6448 = vmatpush3.bf16.msra.mxu0 %v6445_v2  ;;  %6016 = vmatprep.mubr.msk.f32.mxu0 %vm350_vm0, %v7372_v9 }
 0x8ad   : > { %6450 = vmatprep.subr.bf16.mxu0 %v6449_v6 }
 0x8b0   : > { %6452 = vmatpush3.bf16.msra.mxu0 %v6449_v6 }
 0x8b3   : > { %6017 = vmatmul.mubr.msk.f32.vlgmr.msra.gmra.mrb[40].mxu0 %vm350_vm0, %v7374_v10 }
 0x956   : > { %v5897_v7 = vpop.f32.mrb[28].mxu0  ;;  %v5919_v8 = vpop.f32.mrb[24].mxu1 }
 0x957   : > { %v2790_v12 = vpop.f32.mrb[29].mxu0  ;;  %v2940_v13 = vpop.f32.mrb[25].mxu1 }
 0x958   : > { %6023 = vmatprep.mubr.msk.f32.mxu1 %vm1278_vm1, %v2790_v12 }
 0x95e   : > { %v5908_v15 = vpop.f32.mrb[30].mxu0  ;;  %v5941_v17 = vpop.f32.mrb[26].mxu1 }
 0x95f   : > { %v2865_v18 = vpop.f32.mrb[31].mxu0  ;;  %v3090_v19 = vpop.f32.mrb[27].mxu1 }
 0x960   : > { %v6453_v21 = vpack.c.bf16 %v5941_v17, %v3090_v19  ;;  %6030 = vmatprep.mubr.msk.f32.mxu0 %vm1278_vm1, %v2865_v18 }
 0x962   : > { %6455 = vmatprep.subr.msk.bf16.mxu1 %vm7060_vm2, %v6453_v21 }
 0x963   : > { %6458 = vmatpush3.bf16.xpose.msk.msra.mxu1 %vm7060_vm2, %v6453_v21 }
 0x966   : > { %v5930_v9 = vpop.f32.mrb[32].mxu0 }
 0x967   : > { %v5963_v10 = vpop.f32.mrb[28].mxu1  ;;  %v3015_v22 = vpop.f32.mrb[33].mxu0 }
 0x968   : > { %v3240_v23 = vpop.f32.mrb[29].mxu1 }
 0x969   : > { %v6465_v24 = vpack.c.bf16 %v5963_v10, %v3240_v23 }
 0x96a   : > { %6024 = vmatmul.mubr.msk.f32.vlgmr.msra.gmra.mrb[34].mxu1 %vm1278_vm1, %v5897_v7 }
 0x96b   : > { %6467 = vmatprep.subr.msk.bf16.mxu1 %vm7060_vm2, %v6465_v24  ;;  %6037 = vmatprep.mubr.msk.f32.mxu1 %vm1278_vm1, %v2940_v13 }
 0x96c   : > { %6470 = vmatpush3.bf16.xpose.msk.msra.mxu1 %vm7060_vm2, %v6465_v24 }
 0x96e   : > { %v5952_v26 = vpop.f32.mrb[34].mxu0 }
 0x96f   : > { %v5985_v27 = vpop.f32.mrb[30].mxu1  ;;  %v3165_v28 = vpop.f32.mrb[35].mxu0 }
 0x970   : > { %v6459_v29 = vpack.c.bf16 %v5952_v26, %v3165_v28  ;;  %v3390_v31 = vpop.f32.mrb[31].mxu1 }
 0x971   : > { %v6477_v33 = vpack.c.bf16 %v5985_v27, %v3390_v31 }
 0x972   : > { %6461 = vmatprep.subr.msk.bf16.mxu0 %vm7060_vm2, %v6459_v29 }
 0x973   : > { %6038 = vmatmul.mubr.msk.f32.vlgmr.msra.gmra.mrb[36].mxu1 %vm1278_vm1, %v5919_v8  ;;  %6478 = vmatprep.subr.bf16.mxu1 %v6477_v33 }
 0x974   : > { %6464 = vmatpush3.bf16.xpose.msk.msra.mxu0 %vm7060_vm2, %v6459_v29  ;;  %6480 = vmatpush3.bf16.msra.mxu1 %v6477_v33 }
 0x976   : > { %v5974_v34 = vpop.f32.mrb[36].mxu0 }
 0x977   : > { %v6007_v35 = vpop.f32.mrb[32].mxu1  ;;  %v3315_v36 = vpop.f32.mrb[37].mxu0 }
 0x978   : > { %v6471_v37 = vpack.c.bf16 %v5974_v34, %v3315_v36  ;;  %v3540_v38 = vpop.f32.mrb[33].mxu1 }
 0x979   : > { %v6485_v39 = vpack.c.bf16 %v6007_v35, %v3540_v38 }
 0x97a   : > { %6473 = vmatprep.subr.msk.bf16.mxu0 %vm7060_vm2, %v6471_v37 }
 0x97b   : > { %6031 = vmatmul.mubr.msk.f32.vlgmr.msra.gmra.mrb[42].mxu0 %vm1278_vm1, %v5908_v15 }
 0x97c   : > { %6476 = vmatpush3.bf16.xpose.msk.msra.mxu0 %vm7060_vm2, %v6471_v37  ;;  %6044 = vmatprep.mubr.msk.f32.mxu0 %vm1278_vm1, %v3015_v22 }
 0x97d   : > { %6486 = vmatprep.subr.bf16.mxu0 %v6485_v39 }
 0x97e   : > { %v5996_v41 = vpop.f32.mrb[38].mxu0 }
 0x97f   : > { %v3465_v42 = vpop.f32.mrb[39].mxu0 }
 0x980   : > { %v7543_v43 = vpack.c.bf16 %v5996_v41, %v3465_v42 }
 0x982   : > { %6482 = vmatprep.subr.bf16.mxu1 %v7543_v43 }
 0x983   : > { %6045 = vmatmul.mubr.msk.f32.vlgmr.msra.gmra.mrb[44].mxu0 %vm1278_vm1, %v5930_v9 }
 0x984   : > { %6488 = vmatpush3.bf16.msra.mxu0 %v6485_v39 }
 0x986   : > { %v6018_v44 = vpop.f32.mrb[40].mxu0 }
 0x987   : > { %v3615_v45 = vpop.f32.mrb[41].mxu0 }
 0x988   : > { %v7547_v46 = vpack.c.bf16 %v6018_v44, %v3615_v45 }
 0xa3d   : > { %v6025_v47 = vpop.f32.mrb[34].mxu1 }
 0xa3e   : > { %v3708_v48 = vadd.f32 %v6025_v47, %v7103_v3  ;;  %v3702_v55 = vpop.f32.mrb[35].mxu1 }
 0xa3f   : > { %v3703_v49 = vadd.f32 %v3702_v55, %v7099_v62 }
 0xa40   : > { %v3975_v1 = vsel %vm1627_vm3, %v3708_v48, -inf }
 0xa41   : > { %3976 = vmax.xlane.f32.xlu1 %v3975_v1  ;;  %v3972_v0 = vsel %vm1627_vm3, %v3703_v49, -inf }
 0xa42   : > { %3973 = vmax.xlane.f32.xlu0 %v3972_v0 }
 0xa46   : > { %v6039_v50 = vpop.f32.mrb[36].mxu1 }
 0xa47   : > { %v3876_v59 = vpop.f32.mrb[37].mxu1  ;;  %v3882_v57 = vadd.f32 %v6039_v50, %v7118_v16  ;;  %v5223_v50 = vld [vmem:[%s7793_s3 + $0x380] sm:$0xff] }
 0xa48   : > { %v3877_v62 = vadd.f32 %v3876_v59, %v7114_v14  ;;  %v5224_v59 = vld [vmem:[%s7793_s3 + $0x388] sm:$0xff] }
 0xa49   : > { %v3987_v60 = vsel %vm1627_vm3, %v3882_v57, -inf }
 0xa4a   : > { %v3984_v63 = vsel %vm1627_vm3, %v3877_v62, -inf }
 0xa4e   : > { %v6032_v51 = vpop.f32.mrb[42].mxu0 }
 0xa4f   : > { %v3795_v52 = vadd.f32 %v6032_v51, %v7109_v11  ;;  %v3789_v53 = vpop.f32.mrb[43].mxu0  ;;  %v6493_v51 = vpack.c.bf16 %v5224_v59, %v5223_v50 }
 0xa50   : > { %v3790_v56 = vadd.f32 %v6690_v54, %v3789_v53 }
 0xa51   : > { %v3981_v3 = vsel %vm1627_vm3, %v3795_v52, -inf  ;;  %6495 = vmatprep.subr.msk.bf16.mxu0 %vm7060_vm2, %v6493_v51 }
 0xa52   : > { %3982 = vmax.xlane.f32.xlu1 %v3981_v3  ;;  %v3978_v58 = vsel %vm1627_vm3, %v3790_v56, -inf }
 0xa53   : > { %3979 = vmax.xlane.f32.xlu0 %v3978_v58 }
 0xa56   : > { %3988 = vmax.xlane.f32.xlu1 %v3987_v60  ;;  %v6046_v61 = vpop.f32.mrb[44].mxu0 }
 0xa57   : > { %v3969_v11 = vadd.f32 %v6046_v61, %v7127_v25  ;;  %v3963_v2 = vpop.f32.mrb[45].mxu0  ;;  %3985 = vmax.xlane.f32.xlu0 %v3984_v63 }
 0xa58   : > { %v3964_v16 = vadd.f32 %v3963_v2, %v7121_v20 }
 0xa59   : > { %v3993_v4 = vsel %vm1627_vm3, %v3969_v11, -inf }
 0xa5a   : > { %3994 = vmax.xlane.f32.xlu1 %v3993_v4  ;;  %v3990_v14 = vsel %vm1627_vm3, %v3964_v16, -inf }
 0xa5b   : > { %3991 = vmax.xlane.f32.xlu0 %v3990_v14 }
 0xace   : > { %v3977_v5 = vpop.xlane.xlu1 %3976 }
 0xacf   : > { %v3997_v6 = vsub.f32 %v3708_v48, %v3977_v5  ;;  %v3974_v7 = vpop.xlane.xlu0 %3973 }
 0xad0   : > { %v3996_v8 = vsub.f32 %v3703_v49, %v3974_v7 }
 0xad1   : > { %v4006_v12 = vmul.f32 1.442695, %v3997_v6  ;;  %v5226_v6 = vld [vmem:[%s7793_s3 + $0x398] sm:$0xff] }
 0xad2   : > { %v4004_v13 = vmul.f32 1.442695, %v3996_v8 }
 0xad3   : > { %6650 = vpow2.f32 %v4006_v12 }
 0xad4   : > { %6652 = vpow2.f32 %v4004_v13 }
 0xadd   : > { %v6651_v15 = vpop.eup %6650 }
 0xade   : > { %v6653_v25 = vpop.eup %6652  ;;  %v4023_v17 = vsel %vm1627_vm3, %v6651_v15, 0.0 }
 0xadf   : > { %v3983_v18 = vpop.xlane.xlu1 %3982  ;;  %4024 = vadd.xlane.f32.xlu1 %v4023_v17  ;;  %v4020_v20 = vsel %vm1627_vm3, %v6653_v25, 0.0 }
 0xae0   : > { %v3999_v19 = vsub.f32 %v3795_v52, %v3983_v18  ;;  %v3980_v21 = vpop.xlane.xlu0 %3979  ;;  %4021 = vadd.xlane.f32.xlu0 %v4020_v20  ;;  %v5228_v20 = vld [vmem:[%s7793_s3 + $0x3a8] sm:$0xff] }
 0xae1   : > { %v3998_v9 = vsub.f32 %v3790_v56, %v3980_v21  ;;  %v5231_v21 = vld [vmem:[%s7793_s3 + $0x3c0] sm:$0xff] }
 0xae2   : > { %v4010_v10 = vmul.f32 1.442695, %v3999_v19 }
 0xae3   : > { %v4008_v22 = vmul.f32 1.442695, %v3998_v9  ;;  %v3989_v23 = vpop.xlane.xlu1 %3988  ;;  %v5232_v9 = vld [vmem:[%s7793_s3 + $0x3c8] sm:$0xff] }
 0xae4   : > { %6654 = vpow2.f32 %v4010_v10  ;;  %v4001_v24 = vsub.f32 %v3882_v57, %v3989_v23  ;;  %v3986_v26 = vpop.xlane.xlu0 %3985  ;;  %v6517_v10 = vpack.c.bf16 %v5232_v9, %v5231_v21  ;;  %v5230_v23 = vld [vmem:[%s7793_s3 + $0x3b8] sm:$0xff]  ;;  %v5324_v21 = vld [vmem:[%s7795_s5 + $0x68] sm:$0xff] }
 0xae5   : > { %6656 = vpow2.f32 %v4008_v22  ;;  %v4000_v27 = vsub.f32 %v3877_v62, %v3986_v26  ;;  %v5229_v22 = vld [vmem:[%s7793_s3 + $0x3b0] sm:$0xff]  ;;  %v5235_v26 = vld [vmem:[%s7793_s3 + $0x3e0] sm:$0xff] }
 0xae6   : > { %v4014_v28 = vmul.f32 1.442695, %v4001_v24  ;;  %v6511_v24 = vpack.c.bf16 %v5230_v23, %v5229_v22 }
 0xae7   : > { %v4012_v29 = vmul.f32 1.442695, %v4000_v27  ;;  %v3995_v31 = vpop.xlane.xlu1 %3994  ;;  %v5236_v27 = vld [vmem:[%s7793_s3 + $0x3e8] sm:$0xff] }
 0xae8   : > { %6658 = vpow2.f32 %v4014_v28  ;;  %v4003_v33 = vsub.f32 %v3969_v11, %v3995_v31  ;;  %v3992_v34 = vpop.xlane.xlu0 %3991  ;;  %v6529_v28 = vpack.c.bf16 %v5236_v27, %v5235_v26  ;;  %v5234_v31 = vld [vmem:[%s7793_s3 + $0x3d8] sm:$0xff] }
 0xae9   : > { %6660 = vpow2.f32 %v4012_v29  ;;  %v4002_v35 = vsub.f32 %v3964_v16, %v3992_v34  ;;  %v5233_v29 = vld [vmem:[%s7793_s3 + $0x3d0] sm:$0xff] }
 0xaea   : > { %v4018_v36 = vmul.f32 1.442695, %v4003_v33 }
 0xaeb   : > { %v4016_v37 = vmul.f32 1.442695, %v4002_v35  ;;  %v6523_v35 = vpack.c.bf16 %v5234_v31, %v5233_v29  ;;  %v5312_v31 = vld [vmem:[%s7792_s2 + $0x3] ss:$0 sm:$0xff] }
 0xaec   : > { %6662 = vpow2.f32 %v4018_v36  ;;  %v5237_v36 = vld [vmem:[%s7793_s3 + $0x3f0] sm:$0xff] }
 0xaed   : > { %6664 = vpow2.f32 %v4016_v37  ;;  %v5238_v37 = vld [vmem:[%s7793_s3 + $0x3f8] sm:$0xff] }
 0xaee   : > { %v6655_v38 = vpop.eup %6654 }
 0xaef   : > { %v6657_v39 = vpop.eup %6656  ;;  %v4029_v41 = vsel %vm1627_vm3, %v6655_v38, 0.0 }
 0xaf0   : > { %4030 = vadd.xlane.f32.xlu1 %v4029_v41  ;;  %v4026_v42 = vsel %vm1627_vm3, %v6657_v39, 0.0  ;;  %v6535_v41 = vpack.c.bf16 %v5238_v37, %v5237_v36  ;;  %v5325_v37 = vld [vmem:[%s7795_s5 + $0x70] sm:$0xff] }
 0xaf1   : > { %4027 = vadd.xlane.f32.xlu0 %v4026_v42 }
 0xaf2   : > { %v6659_v44 = vpop.eup %6658 }
 0xaf3   : > { %v6661_v45 = vpop.eup %6660  ;;  %v4035_v47 = vsel %vm1627_vm3, %v6659_v44, 0.0 }
 0xaf4   : > { %4036 = vadd.xlane.f32.xlu1 %v4035_v47  ;;  %v4032_v48 = vsel %vm1627_vm3, %v6661_v45, 0.0 }
 0xaf5   : > { %4033 = vadd.xlane.f32.xlu0 %v4032_v48 }
 0xaf6   : > { %v6663_v55 = vpop.eup %6662 }
 0xaf7   : > { %v6665_v49 = vpop.eup %6664  ;;  %v4041_v1 = vsel %vm1627_vm3, %v6663_v55, 0.0 }
 0xaf8   : > { %4042 = vadd.xlane.f32.xlu1 %v4041_v1  ;;  %v4038_v0 = vsel %vm1627_vm3, %v6665_v49, 0.0 }
 0xaf9   : > { %4039 = vadd.xlane.f32.xlu0 %v4038_v0 }
 0xb6c   : > { %v4025_v52 = vpop.xlane.xlu1 %4024 }
 0xb6d   : > { %6666 = vrcp.f32 %v4025_v52  ;;  %v4022_v53 = vpop.xlane.xlu0 %4021 }
 0xb6e   : > { %6668 = vrcp.f32 %v4022_v53 }
 0xb77   : > { %v6667_v54 = vpop.eup %6666 }
 0xb78   : > { %v6669_v56 = vpop.eup %6668  ;;  %v4053_v3 = vmul.f32 %v6667_v54, %v6651_v15 }
 0xb79   : > { %v4052_v57 = vmul.f32 %v6669_v56, %v6653_v25 }
 0xb7b   : > { %6051 = vmatprep.mubr.msk.f32.mxu1 %vm1627_vm3, %v4052_v57 }
 0xb7c   : > { %6052 = vmatmul.mubr.msk.f32.vlgmr.msra.gmra.mrb[38].mxu1 %vm1627_vm3, %v4053_v3 }
 0xb7d   : > { %v4031_v62 = vpop.xlane.xlu1 %4030  ;;  %6484 = vmatpush3.bf16.msra.mxu1 %v7543_v43  ;;  %v5225_v43 = vld [vmem:[%s7793_s3 + $0x390] sm:$0xff] }
 0xb7e   : > { %6670 = vrcp.f32 %v4031_v62  ;;  %6490 = vmatprep.subr.bf16.mxu1 %v7547_v46  ;;  %v4028_v58 = vpop.xlane.xlu0 %4027  ;;  %v6499_v13 = vpack.c.bf16 %v5226_v6, %v5225_v43 }
 0xb7f   : > { %6672 = vrcp.f32 %v4028_v58 }
 0xb81   : > { %v4037_v60 = vpop.xlane.xlu1 %4036 }
 0xb82   : > { %6674 = vrcp.f32 %v4037_v60  ;;  %v4034_v61 = vpop.xlane.xlu0 %4033 }
 0xb83   : > { %6676 = vrcp.f32 %v4034_v61 }
 0xb85   : > { %v4043_v63 = vpop.xlane.xlu1 %4042 }
 0xb86   : > { %6678 = vrcp.f32 %v4043_v63  ;;  %v4040_v11 = vpop.xlane.xlu0 %4039 }
 0xb87   : > { %6680 = vrcp.f32 %v4040_v11 }
 0xb88   : > { %v6671_v2 = vpop.eup %6670 }
 0xb89   : > { %v6673_v16 = vpop.eup %6672  ;;  %v4055_v14 = vmul.f32 %v6671_v2, %v6655_v38 }
 0xb8a   : > { %v4054_v4 = vmul.f32 %v6673_v16, %v6657_v39 }
 0xb8c   : > { %v6675_v5 = vpop.eup %6674  ;;  %6058 = vmatprep.mubr.msk.f32.mxu1 %vm1627_vm3, %v4054_v4 }
 0xb8d   : > { %v6677_v7 = vpop.eup %6676  ;;  %6059 = vmatmul.mubr.msk.f32.vlgmr.msra.gmra.mrb[40].mxu1 %vm1627_vm3, %v4055_v14  ;;  %v4057_v12 = vmul.f32 %v6675_v5, %v6659_v44 }
 0xb8e   : > { %6492 = vmatpush3.bf16.msra.mxu1 %v7547_v46  ;;  %v4056_v8 = vmul.f32 %v6677_v7, %v6661_v45  ;;  %v5227_v46 = vld [vmem:[%s7793_s3 + $0x3a0] sm:$0xff] }
 0xb8f   : > { %v6505_v19 = vpack.c.bf16 %v5228_v20, %v5227_v46  ;;  %v5313_v7 = vld [vmem:[%s7794_s4 + $0x20] sm:$0xff]  ;;  %v5322_v46 = vld [vmem:[%s7795_s5 + $0x58] sm:$0xff] }
 0xb90   : > { %v6679_v15 = vpop.eup %6678  ;;  %6065 = vmatprep.mubr.msk.f32.mxu0 %vm1627_vm3, %v4056_v8 }
 0xb91   : > { %v6681_v25 = vpop.eup %6680  ;;  %6066 = vmatmul.mubr.msk.f32.vlgmr.msra.gmra.mrb[46].mxu0 %vm1627_vm3, %v4057_v12  ;;  %v4059_v18 = vmul.f32 %v6679_v15, %v6663_v55  ;;  %6507 = vmatprep.subr.msk.bf16.mxu1 %vm7060_vm2, %v6505_v19  ;;  %v5316_v12 = vld [vmem:[%s7794_s4 + $0x38] sm:$0xff]  ;;  %v5319_v15 = vld [vmem:[%s7795_s5 + $0x40] sm:$0xff] }
 0xb92   : > { %v4058_v17 = vmul.f32 %v6681_v25, %v6665_v49  ;;  %6498 = vmatpush3.bf16.xpose.msk.msra.mxu0 %vm7060_vm2, %v6493_v51  ;;  %v5320_v25 = vld [vmem:[%s7795_s5 + $0x48] sm:$0xff] }
 0xb93   : > { %6501 = vmatprep.subr.msk.bf16.mxu0 %vm7060_vm2, %v6499_v13 }
 0xb94   : > { %6072 = vmatprep.mubr.msk.f32.mxu1 %vm1627_vm3, %v4058_v17  ;;  %v5321_v17 = vld [vmem:[%s7795_s5 + $0x50] sm:$0xff] }
 0xb95   : > { %6073 = vmatmul.mubr.msk.f32.vlgmr.msra.gmra.mrb[42].mxu1 %vm1627_vm3, %v4059_v18  ;;  %v6549_v18 = vpack.c.bf16 %v5320_v25, %v5319_v15  ;;  %v6553_v20 = vpack.c.bf16 %v5322_v46, %v5321_v17 }
 0xb97   : > { %6510 = vmatpush3.bf16.xpose.msk.msra.mxu1 %vm7060_vm2, %v6505_v19  ;;  %v5323_v19 = vld [vmem:[%s7795_s5 + $0x60] sm:$0xff] }
 0xb98   : > { %6513 = vmatprep.subr.msk.bf16.mxu1 %vm7060_vm2, %v6511_v24  ;;  %v6557_v9 = vpack.c.bf16 %v5324_v21, %v5323_v19 }
 0xb9a   : > { %6504 = vmatpush3.bf16.xpose.msk.msra.mxu0 %vm7060_vm2, %v6499_v13 }
 0xb9b   : > { %6519 = vmatprep.subr.msk.bf16.mxu0 %vm7060_vm2, %v6517_v10 }
 0xb9f   : > { %6516 = vmatpush3.bf16.xpose.msk.msra.mxu1 %vm7060_vm2, %v6511_v24 }
 0xba0   : > { %6531 = vmatprep.subr.msk.bf16.mxu1 %vm7060_vm2, %v6529_v28 }
 0xc4f   : > { %v6053_v33 = vpop.f32.mrb[38].mxu1 }
 0xc50   : > { %v4132_v34 = vpop.f32.mrb[39].mxu1 }
 0xc51   : > { %6083 = vmatprep.mubr.msk.f32.mxu0 %vm1278_vm1, %v4132_v34 }
 0xc52   : > { %6084 = vmatmul.mubr.msk.f32.vlgmr.msra.gmra.mrb[48].mxu0 %vm1278_vm1, %v6053_v33 }
 0xc53   : > { %6522 = vmatpush3.bf16.xpose.msk.msra.mxu0 %vm7060_vm2, %v6517_v10 }
 0xc54   : > { %6525 = vmatprep.subr.msk.bf16.mxu0 %vm7060_vm2, %v6523_v35 }
 0xc5b   : > { %6528 = vmatpush3.bf16.xpose.msk.msra.mxu0 %vm7060_vm2, %v6523_v35 }
 0xc60   : > { %v6060_v38 = vpop.f32.mrb[40].mxu1 }
 0xc61   : > { %v4213_v39 = vpop.f32.mrb[41].mxu1 }
 0xc62   : > { %6094 = vmatprep.mubr.msk.f32.mxu1 %vm1278_vm1, %v4213_v39 }
 0xc63   : > { %6095 = vmatmul.mubr.msk.f32.vlgmr.msra.gmra.mrb[44].mxu1 %vm1278_vm1, %v6060_v38  ;;  %v5326_v38 = vld [vmem:[%s7795_s5 + $0x78] sm:$0xff] }
 0xc64   : > { %6534 = vmatpush3.bf16.xpose.msk.msra.mxu1 %vm7060_vm2, %v6529_v28  ;;  %v6067_v42 = vpop.f32.mrb[46].mxu0  ;;  %v6561_v39 = vpack.c.bf16 %v5326_v38, %v5325_v37 }
 0xc65   : > { %v4294_v44 = vpop.f32.mrb[47].mxu0  ;;  %6537 = vmatprep.subr.msk.bf16.mxu1 %vm7060_vm2, %v6535_v41 }
 0xc66   : > { %6105 = vmatprep.mubr.msk.f32.mxu0 %vm1278_vm1, %v4294_v44 }
 0xc67   : > { %6106 = vmatmul.mubr.msk.f32.vlgmr.msra.gmra.mrb[50].mxu0 %vm1278_vm1, %v6067_v42 }
 0xc68   : > { %v6074_v45 = vpop.f32.mrb[42].mxu1 }
 0xc69   : > { %v4375_v47 = vpop.f32.mrb[43].mxu1 }
 0xc6a   : > { %6116 = vmatprep.mubr.msk.f32.mxu1 %vm1278_vm1, %v4375_v47 }
 0xc6c   : > { %6540 = vmatpush3.bf16.xpose.msk.msra.mxu1 %vm7060_vm2, %v6535_v41 }
 0xc6d   : > { %6550 = vmatprep.subr.bf16.mxu1 %v6549_v18 }
 0xc73   : > { %6117 = vmatmul.mubr.msk.f32.vlgmr.msra.gmra.mrb[46].mxu1 %vm1278_vm1, %v6074_v45 }
 0xc74   : > { %6552 = vmatpush3.bf16.msra.mxu1 %v6549_v18 }
 0xc75   : > { %6554 = vmatprep.subr.bf16.mxu1 %v6553_v20 }
 0xc78   : > { %6556 = vmatpush3.bf16.msra.mxu1 %v6553_v20 }
 0xc79   : > { %6558 = vmatprep.subr.bf16.mxu1 %v6557_v9 }
 0xc7c   : > { %6560 = vmatpush3.bf16.msra.mxu1 %v6557_v9 }
 0xc7d   : > { %6562 = vmatprep.subr.bf16.mxu1 %v6561_v39 }
 0xc80   : > { %6564 = vmatpush3.bf16.msra.mxu1 %v6561_v39 }
 0xd25   : > { %v6085_v48 = vpop.f32.mrb[48].mxu0 }
 0xd26   : > { %v4468_v55 = vpop.f32.mrb[49].mxu0  ;;  %v4763_v1 = vsel %vm350_vm0, %v6085_v48, 0.0 }
 0xd27   : > { %v4756_v59 = vsel %vm350_vm0, %v4468_v55, 0.0 }
 0xd36   : > { %v6096_v49 = vpop.f32.mrb[44].mxu1 }
 0xd37   : > { %v4764_v0 = vsel %vm350_vm0, %v6096_v49, 0.0  ;;  %v4561_v50 = vpop.f32.mrb[45].mxu1 }
 0xd38   : > { %v4765_v51 = vadd.f32 %v4764_v0, %v4763_v1  ;;  %v4757_v52 = vsel %vm350_vm0, %v4561_v50, 0.0 }
 0xd39   : > { %v4758_v53 = vadd.f32 %v4757_v52, %v4756_v59 }
 0xd3a   : > { %v6107_v54 = vpop.f32.mrb[50].mxu0 }
 0xd3b   : > { %v4766_v40 = vsel %vm350_vm0, %v6107_v54, 0.0  ;;  %v4654_v56 = vpop.f32.mrb[51].mxu0 }
 0xd3c   : > { %v4767_v57 = vadd.f32 %v4766_v40, %v4765_v51  ;;  %v4759_v3 = vsel %vm350_vm0, %v4654_v56, 0.0 }
 0xd3d   : > { %v4760_v62 = vadd.f32 %v4759_v3, %v4758_v53  ;;  %v5329_v3 = vld [vmem:[%s7792_s2 + $0x4] ss:$0 sm:$0xff] }
 0xd46   : > { %v6118_v58 = vpop.f32.mrb[46].mxu1 }
 0xd47   : > { %v4768_v60 = vsel %vm350_vm0, %v6118_v58, 0.0  ;;  %v4747_v61 = vpop.f32.mrb[47].mxu1 }
 0xd48   : > { %v4769_v63 = vadd.f32 %v4768_v60, %v4767_v57  ;;  %v4761_v11 = vsel %vm350_vm0, %v4747_v61, 0.0 }
 0xd49   : > { %v4762_v2 = vadd.f32 %v4761_v11, %v4760_v62 }
 0xd4a   : > { %v4771_v16 = vadd.f32 %v4769_v63, %v7308_v30  ;;  %v5314_v30 = vld [vmem:[%s7794_s4 + $0x28] sm:$0xff] }
 0xd4b   : > { %v7682_v4 = vadd.f32 %v4762_v2, %v7311_v32  ;;  %v5315_v32 = vld [vmem:[%s7794_s4 + $0x30] sm:$0xff]  ;;  %v6541_v8 = vpack.c.bf16 %v5314_v30, %v5313_v7 }
 0xd4c   : > { %v4774_v14 = vmul.f32 %v4771_v16, %v4771_v16  ;;  %v6545_v13 = vpack.c.bf16 %v5316_v12, %v5315_v32 }
 0xd4d   : > { %v4773_v5 = vmul.f32 %v7682_v4, %v7682_v4  ;;  %6542 = vmatprep.subr.bf16.mxu0 %v6541_v8 }
 0xd4e   : > { %v4778_v43 = vsel %vm350_vm0, %v4774_v14, 0.0  ;;  %6544 = vmatpush3.bf16.msra.mxu0 %v6541_v8 }
 0xd4f   : > { %4779 = vadd.xlane.f32.xlu1 %v4778_v43  ;;  %v4775_v6 = vsel %vm350_vm0, %v4773_v5, 0.0  ;;  %6546 = vmatprep.subr.bf16.mxu0 %v6545_v13 }
 0xd50   : > { %4776 = vadd.xlane.f32.xlu0 %v4775_v6 }
 0xd52   : > { %6548 = vmatpush3.bf16.msra.mxu0 %v6545_v13 }
 0xddc   : > { %v4780_v10 = vpop.xlane.xlu1 %4779 }
 0xddd   : > { %v4782_v22 = vmul.f32 0.03125, %v4780_v10  ;;  %v4777_v23 = vpop.xlane.xlu0 %4776 }
 0xdde   : > { %v4781_v24 = vmul.f32 0.03125, %v4777_v23 }
 0xddf   : > { %v4784_v26 = vadd.f32 1e-06, %v4782_v22 }
 0xde0   : > { %v4783_v27 = vadd.f32 1e-06, %v4781_v24 }
 0xde1   : > { %6682 = vrsqrt.f32 %v4784_v26 }
 0xde2   : > { %6684 = vrsqrt.f32 %v4783_v27 }
 0xdeb   : > { %v6683_v28 = vpop.eup %6682 }
 0xdec   : > { %v6685_v29 = vpop.eup %6684  ;;  %v4788_v33 = vmul.f32 %v6683_v28, %v4771_v16 }
 0xded   : > { %v4787_v34 = vmul.f32 %v6685_v29, %v7682_v4 }
 0xdee   : > { %v4794_v36 = vmul.f32 %v5312_v31, %v4788_v33 }
 0xdef   : > { %v4793_v35 = vmul.f32 %v5312_v31, %v4787_v34 }
 0xdf1   : > { %6127 = vmatprep.mubr.msk.f32.mxu0 %vm350_vm0, %v4793_v35 }
 0xdf2   : > { %6128 = vmatmul.mubr.msk.f32.vlgmr.msra.gmra.mrb[52].mxu0 %vm350_vm0, %v4794_v36 }
 0xec5   : > { %v6129_v41 = vpop.f32.mrb[52].mxu0 }
 0xec6   : > { %v4872_v42 = vpop.f32.mrb[53].mxu0  ;;  %v4882_v45 = vmax.f32 %v6129_v41, 0.0 }
 0xec7   : > { %v4881_v44 = vmax.f32 %v4872_v42, 0.0 }
 0xec9   : > { %6146 = vmatprep.mubr.msk.f32.mxu1 %vm2546_vm4, %v4881_v44 }
 0xeca   : > { %6147 = vmatmul.mubr.msk.f32.vlgmr.msra.gmra.mrb[48].mxu1 %vm2546_vm4, %v4882_v45 }
 0xf9d   : > { %v6148_v47 = vpop.f32.mrb[48].mxu1 }
 0xf9e   : > { %v4974_v48 = vadd.f32 %v6148_v47, %v4771_v16  ;;  %v4964_v55 = vpop.f32.mrb[49].mxu1 }
 0xf9f   : > { %v4973_v49 = vadd.f32 %v4964_v55, %v7682_v4 }
 0xfa0   : > { %v4977_v1 = vmul.f32 %v4974_v48, %v4974_v48 }
 0xfa1   : > { %v4976_v0 = vmul.f32 %v4973_v49, %v4973_v49 }
 0xfa2   : > { %v4981_v50 = vsel %vm350_vm0, %v4977_v1, 0.0 }
 0xfa3   : > { %4982 = vadd.xlane.f32.xlu1 %v4981_v50  ;;  %v4978_v59 = vsel %vm350_vm0, %v4976_v0, 0.0 }
 0xfa4   : > { %4979 = vadd.xlane.f32.xlu0 %v4978_v59 }
0x1030   : > { %v4983_v51 = vpop.xlane.xlu1 %4982 }
0x1031   : > { %v4985_v52 = vmul.f32 0.03125, %v4983_v51  ;;  %v4980_v53 = vpop.xlane.xlu0 %4979 }
0x1032   : > { %v4984_v54 = vmul.f32 0.03125, %v4980_v53 }
0x1033   : > { %v4987_v40 = vadd.f32 1e-06, %v4985_v52 }
0x1034   : > { %v4986_v56 = vadd.f32 1e-06, %v4984_v54 }
0x1035   : > { %6686 = vrsqrt.f32 %v4987_v40 }
0x1036   : > { %6688 = vrsqrt.f32 %v4986_v56 }
0x103f   : > { %v6687_v57 = vpop.eup %6686 }
0x1040   : > { %v6689_v62 = vpop.eup %6688  ;;  %v4991_v58 = vmul.f32 %v6687_v57, %v4974_v48 }
0x1041   : > { %v4990_v60 = vmul.f32 %v6689_v62, %v4973_v49 }
0x1042   : > { %v4997_v61 = vmul.f32 %v5329_v3, %v4991_v58 }
0x1043   : > { %v4996_v63 = vmul.f32 %v5329_v3, %v4990_v60 }
0x1044   : > { %4999 = vst.msk [vmem:[%s260_s16 + $0x8] sm:$0xff] %vm350_vm0, %v4997_v61 }
0x1045   : > { %4998 = vst.msk [vmem:[%s260_s16] sm:$0xff] %vm350_vm0, %v4996_v63 }
0x1046   : > { %6704 = shalt.err (!%p6701_p4)
}
0x1047   : > { %s6705_s10 = scalar_lea.hbm %s7743_s20, 256  ;;  %s6709_s11 = scalar_lea.hbm %s7796_s6, 512 }
0x1048   : > { %p6706_p7 = scmp.ne.s32.totalorder %s7743_s20, %s6705_s10  ;;  %p6710_p10 = scmp.lt.u32.totalorder %s7743_s20, %s7796_s6 }
0x1049   : > { %p6711_p11 = scmp.lt.u32.totalorder %s6709_s11, %s6705_s10  ;;  %p6713_p13 = scmp.lt.u32.totalorder %s6705_s10, %s7743_s20 }
0x104a   : > { %p6707_p8 = pnand %p6706_p7, %p6831_p5 }
0x104b   : > { %p6712_p12 = por %p6711_p11, %p6710_p10 }
0x104c   : > { %p6708_p9 = pneg %p6707_p8 }
0x104d   : > { %p6714_p0 = por %p6713_p13, %p6712_p12 }
0x104f   : > { %p6715_p1 = pnand %p6714_p0, %p6708_p9 }
0x1051   : > { %6718 = shalt.err (!%p6715_p1)
}
0x1052   : > { %s6756_s16 = smov 128   ;;  %s6757_s18 = smov 8  }
0x1053   : > { %6565 = dma.vmem_to_hbm [thread:$0]  (%p6831_p5), %s7745_s17, 256, %s7743_s20, %s7749_s25, %s6756_s16, %s6756_s16, %s6757_s18  }
0x1054 PF: > { %p6571_p2 = scmp.ge.s32.totalorder %s6753_s24, 2  ;;  %s5029_s19 = sand.u32 1, %s6741_s21  }
0x1055   : > { %s5030_s26 = scalar_lea.sflag [#allocation3], %s5029_s19 }
0x1056   : > { %p6568_p3 = pnand %p6571_p2, %p6835_p6 }
0x1058   : > { %6736 = dma.done.wait (!%p6568_p3), %s5030_s26, 256  }
0x1059   : > { %6738 = vsyncadd (!%p6568_p3), %s5030_s26, 4294967040  ;;  %p16_p4 = scmp.ge.s32.totalorder %s6818_s27, 4   ;;  %s7801_s21 = smov %s6745_s22 }
0x105a   : > { %s7802_s22 = smov %s6749_s23  ;;  %s7803_s23 = smov %s6829_s30 }
0x105b   : > { %s7804_s24 = smov %s6818_s27  ;;  %18 = sbr.rel (!%p16_p4) target bundleno = 3 (0x3), region = 85 }
0x1062   :  { %5035 = vsyncpa [#allocation3], 1 }
0x1063   :  { %5037 = vsyncpa [#allocation3 + $0x1], 1 }

</bundles_post_ra>
